<compile_context>
chip_gen: v7x
topology: tpu7x:2x2x1
jax: 0.10.0
libtpu: 0.0.40
codegen_flags: <defaults>
</compile_context>

<pallas_src>
import functools

import jax
import jax.numpy as jnp
from jax.experimental import pallas as pl
from jax.experimental.pallas import tpu as pltpu

NUM_ATOM_FEATURES = 9
VOCAB = 100
VOCAB_PAD = 128          # per-feature vocab rows padded to 128 (K alignment)
LANE = 128               # padded hidden / class width (lane-dense vregs)


# ----------------------------------------------------------------------------
# Fused Pallas kernel: AtomEncoder -> GCN convs -> mean pool -> linear
# ----------------------------------------------------------------------------
def _gcn_fused_kernel(ids_ref, emb_ref, a_ref, w_ref, b_ref, batch_ref,
                      ow_ref, ob_ref, o_ref, *, num_layers, num_graphs):
    n_nodes = ids_ref.shape[0]
    k_enc = emb_ref.shape[0]                       # 9 * 128 = 1152

    # ---- AtomEncoder: ONE wide-K matmul (N,1152) @ (1152,128) --------------
    # ids are pre-offset by 128*i in the wrapper so each feature's one-hot
    # lands in its own disjoint 128-wide column block of a single one-hot.
    col = jax.lax.broadcasted_iota(jnp.int32, (n_nodes, k_enc), 1)
    hit = ids_ref[:, 0:1] == col
    for i in range(1, NUM_ATOM_FEATURES):
        hit = hit | (ids_ref[:, i:i + 1] == col)
    x = jnp.dot(hit.astype(jnp.bfloat16), emb_ref[...],
                preferred_element_type=jnp.float32)            # (N, 128) f32

    # ---- GCN convolution layers: act(A_hat @ (X @ W) + b) ------------------
    a_hat = a_ref[...]                                          # (N, N) bf16
    for l in range(num_layers):
        xw = jnp.dot(x.astype(jnp.bfloat16), w_ref[l],
                     preferred_element_type=jnp.float32)        # (N, 128)
        x = jnp.dot(a_hat, xw.astype(jnp.bfloat16),
                    preferred_element_type=jnp.float32) + b_ref[l]
        if l < num_layers - 1:
            x = jnp.maximum(x, 0.0)          # f32 elementwise (v5e-safe)

    # ---- readout: global mean pool (segment mean, in-kernel) ---------------
    gid = jax.lax.broadcasted_iota(jnp.int32, (num_graphs, n_nodes), 0)
    pool = (batch_ref[...] == gid).astype(jnp.float32)          # (G, N)
    counts = jnp.maximum(jnp.sum(pool, axis=1, keepdims=True), 1.0)
    inv_counts = pl.reciprocal(counts, approx=True)             # EUP slot
    pooled = jnp.dot(pool.astype(jnp.bfloat16), x.astype(jnp.bfloat16),
                     preferred_element_type=jnp.float32) * inv_counts

    # ---- final dropout: identity in eval mode ------------------------------
    # ---- transformation: linear -> logits (only HBM write, lane-dense) -----
    logits = jnp.dot(pooled.astype(jnp.bfloat16), ow_ref[...],
                     preferred_element_type=jnp.float32) + ob_ref[...]
    o_ref[...] = logits.astype(o_ref.dtype)


# ----------------------------------------------------------------------------
# Graph preprocessing (plain JAX glue) + parameters
# ----------------------------------------------------------------------------
def build_normalized_adjacency(edge_index, num_nodes):
    """D^-1/2 (A + I) D^-1/2 as a dense [N, N] matrix (GCNConv normalization).

    TODO(synk): this symmetrizes and deduplicates edges; PyG's gcn_norm
    scatter-adds the edge list as given, so directed / multigraph inputs may
    normalize slightly differently.
    """
    src, dst = edge_index[0], edge_index[1]
    a = jnp.zeros((num_nodes, num_nodes), jnp.float32)
    a = a.at[src, dst].set(1.0)
    a = a.at[dst, src].set(1.0)
    a = a + jnp.eye(num_nodes, dtype=jnp.float32)   # self loops
    deg = jnp.sum(a, axis=1)
    d_inv_sqrt = jnp.where(deg > 0, 1.0 / jnp.sqrt(deg), 0.0)
    return a * d_inv_sqrt[:, None] * d_inv_sqrt[None, :]


def init_params(key, hidden, num_classes, num_conv_layers):
    ks = jax.random.split(key, 3 + 2 * num_conv_layers)
    params = {}
    # AtomEncoder: 9 embedding tables of (100, hidden).
    params["emb_tables"] = 0.1 * jax.random.normal(
        ks[0], (NUM_ATOM_FEATURES, VOCAB, hidden), jnp.float32)
    params["conv_w"] = []
    params["conv_b"] = []
    for l in range(num_conv_layers):
        params["conv_w"].append(
            jax.random.normal(ks[1 + 2 * l], (hidden, hidden), jnp.float32)
            * (1.0 / jnp.sqrt(hidden)))
        params["conv_b"].append(jnp.zeros((hidden,), jnp.float32))
    params["out_w"] = jax.random.normal(
        ks[1 + 2 * num_conv_layers], (hidden, num_classes), jnp.float32) \
        * (1.0 / jnp.sqrt(hidden))
    params["out_b"] = jnp.zeros((num_classes,), jnp.float32)
    return params


@functools.partial(jax.jit, static_argnames=("num_graphs",))
def gcn_forward(params, x_atoms, edge_index, batch, *, num_graphs):
    num_nodes = x_atoms.shape[0]
    hidden = params["emb_tables"].shape[-1]
    num_classes = params["out_w"].shape[-1]
    num_layers = len(params["conv_w"])

    # Glue: dense normalized adjacency (bf16 for the MXU).
    # TODO(synk): keep A_hat in f32 if bit-level parity with PyTorch matters.
    a_hat = build_normalized_adjacency(edge_index, num_nodes).astype(jnp.bfloat16)

    # --- pad everything to lane-dense (128) widths; zero-padding is exact ---
    emb_p = jnp.zeros((NUM_ATOM_FEATURES, VOCAB_PAD, LANE), jnp.float32)
    emb_p = emb_p.at[:, :VOCAB, :hidden].set(params["emb_tables"])
    emb = emb_p.reshape(NUM_ATOM_FEATURES * VOCAB_PAD, LANE).astype(jnp.bfloat16)

    w = jnp.zeros((num_layers, LANE, LANE), jnp.float32)
    w = w.at[:, :hidden, :hidden].set(jnp.stack(params["conv_w"])).astype(jnp.bfloat16)
    b = jnp.zeros((num_layers, 1, LANE), jnp.float32)
    b = b.at[:, 0, :hidden].set(jnp.stack(params["conv_b"]))

    ow = jnp.zeros((LANE, LANE), jnp.float32)
    ow = ow.at[:hidden, :num_classes].set(params["out_w"]).astype(jnp.bfloat16)
    ob = jnp.zeros((1, LANE), jnp.float32)
    ob = ob.at[0, :num_classes].set(params["out_b"])

    # Offset atom ids so feature i's one-hot occupies columns [128*i, 128*i+100).
    offsets = (jnp.arange(NUM_ATOM_FEATURES, dtype=jnp.int32) * VOCAB_PAD)[None, :]
    ids = x_atoms.astype(jnp.int32) + offsets                    # (N, 9)

    batch2d = batch.reshape(1, num_nodes).astype(jnp.int32)      # (1, N)

    kernel = functools.partial(_gcn_fused_kernel,
                               num_layers=num_layers,
                               num_graphs=num_graphs)

    def full(shape):
        return pl.BlockSpec(shape, lambda i, _s=shape: (0,) * len(_s))

    logits_padded = pl.pallas_call(
        kernel,
        out_shape=jax.ShapeDtypeStruct((num_graphs, LANE), jnp.float32),
        grid=(1,),
        in_specs=[
            full((num_nodes, NUM_ATOM_FEATURES)),                # offset atom ids
            full((NUM_ATOM_FEATURES * VOCAB_PAD, LANE)),         # stacked emb slab
            full((num_nodes, num_nodes)),                        # A_hat
            full((num_layers, LANE, LANE)),                      # conv weights
            full((num_layers, 1, LANE)),                         # conv biases
            full((1, num_nodes)),                                # batch (graph ids)
            full((LANE, LANE)),                                  # out weight
            full((1, LANE)),                                     # out bias
        ],
        out_specs=full((num_graphs, LANE)),
        compiler_params=pltpu.CompilerParams(
            dimension_semantics=("arbitrary",),
            vmem_limit_bytes=64 * 1024 * 1024),
    )(ids, emb, a_hat, w, b, batch2d, ow, ob)

    return logits_padded[:, :num_classes]


if __name__ == "__main__":
    key = jax.random.PRNGKey(0)
    k_feat, k_edge, k_batch, k_param = jax.random.split(key, 4)

    N_NODES = 16      # total nodes across the mini-batch of graphs
    N_EDGES = 32
    N_GRAPHS = 2
    HIDDEN = 32       # AtomEncoder hidden_channels = 32 (as in module)
    NUM_CLASSES = 4
    NUM_CONV_LAYERS = 2

    # Integer atom features in [0, 100), 9 per node.
    x_atoms = jax.random.randint(k_feat, (N_NODES, NUM_ATOM_FEATURES), 0, VOCAB,
                                 dtype=jnp.int32)
    edge_index = jax.random.randint(k_edge, (2, N_EDGES), 0, N_NODES,
                                    dtype=jnp.int32)
    # Node -> graph assignment (sorted, as PyG batches are).
    batch = jnp.sort(jax.random.randint(k_batch, (N_NODES,), 0, N_GRAPHS,
                                        dtype=jnp.int32))

    params = init_params(k_param, HIDDEN, NUM_CLASSES, NUM_CONV_LAYERS)

    logits = gcn_forward(params, x_atoms, edge_index, batch,
                         num_graphs=N_GRAPHS)
    jax.block_until_ready(logits)
    assert logits.shape == (N_GRAPHS, NUM_CLASSES)
    assert logits.dtype == jnp.float32
    print("KERNEL_OK")
</pallas_src>

<mosaic_0001>
module attributes {stable_mosaic.version = 11 : i64} {
  func.func @_gcn_fused_kernel(%arg0: i32, %arg1: memref<16x9xi32, #tpu.memory_space<vmem>>, %arg2: memref<1152x128xbf16, #tpu.memory_space<vmem>>, %arg3: memref<16x16xbf16, #tpu.memory_space<vmem>>, %arg4: memref<2x128x128xbf16, #tpu.memory_space<vmem>>, %arg5: memref<2x1x128xf32, #tpu.memory_space<vmem>>, %arg6: memref<1x16xi32, #tpu.memory_space<vmem>>, %arg7: memref<128x128xbf16, #tpu.memory_space<vmem>>, %arg8: memref<1x128xf32, #tpu.memory_space<vmem>>, %arg9: memref<2x128xf32, #tpu.memory_space<vmem>>) attributes {dimension_semantics = [#tpu.dimension_semantics<arbitrary>], iteration_bounds = array<i64: 1>, scalar_prefetch = 0 : i64, scratch_operands = 0 : i64, tpu.core_type = #tpu.core_type<tc>, window_params = [{pipeline_mode = #tpu.pipeline_mode<synchronous>, transform_indices = @transform_0, window_bounds = array<i64: 16, 9>}, {pipeline_mode = #tpu.pipeline_mode<synchronous>, transform_indices = @transform_1, window_bounds = array<i64: 1152, 128>}, {pipeline_mode = #tpu.pipeline_mode<synchronous>, transform_indices = @transform_2, window_bounds = array<i64: 16, 16>}, {pipeline_mode = #tpu.pipeline_mode<synchronous>, transform_indices = @transform_3, window_bounds = array<i64: 2, 128, 128>}, {pipeline_mode = #tpu.pipeline_mode<synchronous>, transform_indices = @transform_4, window_bounds = array<i64: 2, 1, 128>}, {pipeline_mode = #tpu.pipeline_mode<synchronous>, transform_indices = @transform_5, window_bounds = array<i64: 1, 16>}, {pipeline_mode = #tpu.pipeline_mode<synchronous>, transform_indices = @transform_6, window_bounds = array<i64: 128, 128>}, {pipeline_mode = #tpu.pipeline_mode<synchronous>, transform_indices = @transform_7, window_bounds = array<i64: 1, 128>}, {pipeline_mode = #tpu.pipeline_mode<synchronous>, transform_indices = @transform_8, window_bounds = array<i64: 2, 128>}]} {
    %0 = tpu.iota {dimensions = array<i32: 1>} : vector<16x1152xi32>
    %c0 = arith.constant 0 : index
    %c0_0 = arith.constant 0 : index
    %1 = vector.load %arg1[%c0, %c0_0] : memref<16x9xi32, #tpu.memory_space<vmem>>, vector<16x1xi32>
    %2 = vector.broadcast %1 : vector<16x1xi32> to vector<16x1152xi32>
    %3 = arith.cmpi eq, %2, %0 : vector<16x1152xi32>
    %c0_1 = arith.constant 0 : index
    %c1 = arith.constant 1 : index
    %4 = vector.load %arg1[%c0_1, %c1] : memref<16x9xi32, #tpu.memory_space<vmem>>, vector<16x1xi32>
    %5 = vector.broadcast %4 : vector<16x1xi32> to vector<16x1152xi32>
    %6 = arith.cmpi eq, %5, %0 : vector<16x1152xi32>
    %7 = arith.ori %3, %6 : vector<16x1152xi1>
    %c0_2 = arith.constant 0 : index
    %c2 = arith.constant 2 : index
    %8 = vector.load %arg1[%c0_2, %c2] : memref<16x9xi32, #tpu.memory_space<vmem>>, vector<16x1xi32>
    %9 = vector.broadcast %8 : vector<16x1xi32> to vector<16x1152xi32>
    %10 = arith.cmpi eq, %9, %0 : vector<16x1152xi32>
    %11 = arith.ori %7, %10 : vector<16x1152xi1>
    %c0_3 = arith.constant 0 : index
    %c3 = arith.constant 3 : index
    %12 = vector.load %arg1[%c0_3, %c3] : memref<16x9xi32, #tpu.memory_space<vmem>>, vector<16x1xi32>
    %13 = vector.broadcast %12 : vector<16x1xi32> to vector<16x1152xi32>
    %14 = arith.cmpi eq, %13, %0 : vector<16x1152xi32>
    %15 = arith.ori %11, %14 : vector<16x1152xi1>
    %c0_4 = arith.constant 0 : index
    %c4 = arith.constant 4 : index
    %16 = vector.load %arg1[%c0_4, %c4] : memref<16x9xi32, #tpu.memory_space<vmem>>, vector<16x1xi32>
    %17 = vector.broadcast %16 : vector<16x1xi32> to vector<16x1152xi32>
    %18 = arith.cmpi eq, %17, %0 : vector<16x1152xi32>
    %19 = arith.ori %15, %18 : vector<16x1152xi1>
    %c0_5 = arith.constant 0 : index
    %c5 = arith.constant 5 : index
    %20 = vector.load %arg1[%c0_5, %c5] : memref<16x9xi32, #tpu.memory_space<vmem>>, vector<16x1xi32>
    %21 = vector.broadcast %20 : vector<16x1xi32> to vector<16x1152xi32>
    %22 = arith.cmpi eq, %21, %0 : vector<16x1152xi32>
    %23 = arith.ori %19, %22 : vector<16x1152xi1>
    %c0_6 = arith.constant 0 : index
    %c6 = arith.constant 6 : index
    %24 = vector.load %arg1[%c0_6, %c6] : memref<16x9xi32, #tpu.memory_space<vmem>>, vector<16x1xi32>
    %25 = vector.broadcast %24 : vector<16x1xi32> to vector<16x1152xi32>
    %26 = arith.cmpi eq, %25, %0 : vector<16x1152xi32>
    %27 = arith.ori %23, %26 : vector<16x1152xi1>
    %c0_7 = arith.constant 0 : index
    %c7 = arith.constant 7 : index
    %28 = vector.load %arg1[%c0_7, %c7] : memref<16x9xi32, #tpu.memory_space<vmem>>, vector<16x1xi32>
    %29 = vector.broadcast %28 : vector<16x1xi32> to vector<16x1152xi32>
    %30 = arith.cmpi eq, %29, %0 : vector<16x1152xi32>
    %31 = arith.ori %27, %30 : vector<16x1152xi1>
    %c0_8 = arith.constant 0 : index
    %c8 = arith.constant 8 : index
    %32 = vector.load %arg1[%c0_8, %c8] : memref<16x9xi32, #tpu.memory_space<vmem>>, vector<16x1xi32>
    %33 = vector.broadcast %32 : vector<16x1xi32> to vector<16x1152xi32>
    %34 = arith.cmpi eq, %33, %0 : vector<16x1152xi32>
    %35 = arith.ori %31, %34 : vector<16x1152xi1>
    %36 = arith.extui %35 : vector<16x1152xi1> to vector<16x1152xi32>
    %37 = arith.sitofp %36 : vector<16x1152xi32> to vector<16x1152xf32>
    %38 = arith.truncf %37 : vector<16x1152xf32> to vector<16x1152xbf16>
    %c0_9 = arith.constant 0 : index
    %c0_10 = arith.constant 0 : index
    %39 = vector.load %arg2[%c0_9, %c0_10] : memref<1152x128xbf16, #tpu.memory_space<vmem>>, vector<1152x128xbf16>
    %cst = arith.constant dense<0.000000e+00> : vector<16x128xf32>
    %40 = tpu.matmul %38, %39, %cst {dimension_numbers = #tpu.dot_dimension_numbers<[1], [0], [0], [1], [0, 0, 1, 1], [], []>} : vector<16x1152xbf16>, vector<1152x128xbf16>, vector<16x128xf32> -> vector<16x128xf32>
    %c0_11 = arith.constant 0 : index
    %c0_12 = arith.constant 0 : index
    %41 = vector.load %arg3[%c0_11, %c0_12] : memref<16x16xbf16, #tpu.memory_space<vmem>>, vector<16x16xbf16>
    %42 = arith.truncf %40 : vector<16x128xf32> to vector<16x128xbf16>
    %c0_13 = arith.constant 0 : index
    %c0_14 = arith.constant 0 : index
    %c0_15 = arith.constant 0 : index
    %43 = vector.load %arg4[%c0_13, %c0_14, %c0_15] : memref<2x128x128xbf16, #tpu.memory_space<vmem>>, vector<1x128x128xbf16>
    %44 = vector.shape_cast %43 : vector<1x128x128xbf16> to vector<128x128xbf16>
    %cst_16 = arith.constant dense<0.000000e+00> : vector<16x128xf32>
    %45 = tpu.matmul %42, %44, %cst_16 {dimension_numbers = #tpu.dot_dimension_numbers<[1], [0], [0], [1], [0, 0, 1, 1], [], []>} : vector<16x128xbf16>, vector<128x128xbf16>, vector<16x128xf32> -> vector<16x128xf32>
    %46 = arith.truncf %45 : vector<16x128xf32> to vector<16x128xbf16>
    %cst_17 = arith.constant dense<0.000000e+00> : vector<16x128xf32>
    %47 = tpu.matmul %41, %46, %cst_17 {dimension_numbers = #tpu.dot_dimension_numbers<[1], [0], [0], [1], [0, 0, 1, 1], [], []>} : vector<16x16xbf16>, vector<16x128xbf16>, vector<16x128xf32> -> vector<16x128xf32>
    %c0_18 = arith.constant 0 : index
    %c0_19 = arith.constant 0 : index
    %c0_20 = arith.constant 0 : index
    %48 = vector.load %arg5[%c0_18, %c0_19, %c0_20] : memref<2x1x128xf32, #tpu.memory_space<vmem>>, vector<1x1x128xf32>
    %49 = vector.shape_cast %48 : vector<1x1x128xf32> to vector<1x128xf32>
    %50 = vector.broadcast %49 : vector<1x128xf32> to vector<16x128xf32>
    %51 = arith.addf %47, %50 : vector<16x128xf32>
    %cst_21 = arith.constant 0.000000e+00 : f32
    %52 = vector.broadcast %cst_21 : f32 to vector<16x128xf32>
    %53 = arith.maximumf %51, %52 : vector<16x128xf32>
    %54 = arith.truncf %53 : vector<16x128xf32> to vector<16x128xbf16>
    %c1_22 = arith.constant 1 : index
    %c0_23 = arith.constant 0 : index
    %c0_24 = arith.constant 0 : index
    %55 = vector.load %arg4[%c1_22, %c0_23, %c0_24] : memref<2x128x128xbf16, #tpu.memory_space<vmem>>, vector<1x128x128xbf16>
    %56 = vector.shape_cast %55 : vector<1x128x128xbf16> to vector<128x128xbf16>
    %cst_25 = arith.constant dense<0.000000e+00> : vector<16x128xf32>
    %57 = tpu.matmul %54, %56, %cst_25 {dimension_numbers = #tpu.dot_dimension_numbers<[1], [0], [0], [1], [0, 0, 1, 1], [], []>} : vector<16x128xbf16>, vector<128x128xbf16>, vector<16x128xf32> -> vector<16x128xf32>
    %58 = arith.truncf %57 : vector<16x128xf32> to vector<16x128xbf16>
    %cst_26 = arith.constant dense<0.000000e+00> : vector<16x128xf32>
    %59 = tpu.matmul %41, %58, %cst_26 {dimension_numbers = #tpu.dot_dimension_numbers<[1], [0], [0], [1], [0, 0, 1, 1], [], []>} : vector<16x16xbf16>, vector<16x128xbf16>, vector<16x128xf32> -> vector<16x128xf32>
    %c1_27 = arith.constant 1 : index
    %c0_28 = arith.constant 0 : index
    %c0_29 = arith.constant 0 : index
    %60 = vector.load %arg5[%c1_27, %c0_28, %c0_29] : memref<2x1x128xf32, #tpu.memory_space<vmem>>, vector<1x1x128xf32>
    %61 = vector.shape_cast %60 : vector<1x1x128xf32> to vector<1x128xf32>
    %62 = vector.broadcast %61 : vector<1x128xf32> to vector<16x128xf32>
    %63 = arith.addf %59, %62 : vector<16x128xf32>
    %64 = tpu.iota {dimensions = array<i32: 0>} : vector<2x16xi32>
    %c0_30 = arith.constant 0 : index
    %c0_31 = arith.constant 0 : index
    %65 = vector.load %arg6[%c0_30, %c0_31] : memref<1x16xi32, #tpu.memory_space<vmem>>, vector<1x16xi32>
    %66 = vector.broadcast %65 : vector<1x16xi32> to vector<2x16xi32>
    %67 = arith.cmpi eq, %66, %64 : vector<2x16xi32>
    %68 = arith.extui %67 : vector<2x16xi1> to vector<2x16xi32>
    %69 = arith.sitofp %68 : vector<2x16xi32> to vector<2x16xf32>
    %cst_32 = arith.constant dense<0.000000e+00> : vector<2xf32>
    %70 = vector.multi_reduction <add>, %69, %cst_32 [1] : vector<2x16xf32> to vector<2xf32>
    %71 = vector.shape_cast %70 : vector<2xf32> to vector<2x1xf32>
    %cst_33 = arith.constant 1.000000e+00 : f32
    %72 = vector.broadcast %cst_33 : f32 to vector<2x1xf32>
    %73 = arith.maximumf %71, %72 : vector<2x1xf32>
    %74 = tpu.reciprocal %73 {approx = true} : vector<2x1xf32> -> vector<2x1xf32>
    %75 = arith.truncf %69 : vector<2x16xf32> to vector<2x16xbf16>
    %76 = arith.truncf %63 : vector<16x128xf32> to vector<16x128xbf16>
    %cst_34 = arith.constant dense<0.000000e+00> : vector<2x128xf32>
    %77 = tpu.matmul %75, %76, %cst_34 {dimension_numbers = #tpu.dot_dimension_numbers<[1], [0], [0], [1], [0, 0, 1, 1], [], []>} : vector<2x16xbf16>, vector<16x128xbf16>, vector<2x128xf32> -> vector<2x128xf32>
    %78 = vector.broadcast %74 : vector<2x1xf32> to vector<2x128xf32>
    %79 = arith.mulf %77, %78 : vector<2x128xf32>
    %80 = arith.truncf %79 : vector<2x128xf32> to vector<2x128xbf16>
    %c0_35 = arith.constant 0 : index
    %c0_36 = arith.constant 0 : index
    %81 = vector.load %arg7[%c0_35, %c0_36] : memref<128x128xbf16, #tpu.memory_space<vmem>>, vector<128x128xbf16>
    %cst_37 = arith.constant dense<0.000000e+00> : vector<2x128xf32>
    %82 = tpu.matmul %80, %81, %cst_37 {dimension_numbers = #tpu.dot_dimension_numbers<[1], [0], [0], [1], [0, 0, 1, 1], [], []>} : vector<2x128xbf16>, vector<128x128xbf16>, vector<2x128xf32> -> vector<2x128xf32>
    %c0_38 = arith.constant 0 : index
    %c0_39 = arith.constant 0 : index
    %83 = vector.load %arg8[%c0_38, %c0_39] : memref<1x128xf32, #tpu.memory_space<vmem>>, vector<1x128xf32>
    %84 = vector.broadcast %83 : vector<1x128xf32> to vector<2x128xf32>
    %85 = arith.addf %82, %84 : vector<2x128xf32>
    %c0_40 = arith.constant 0 : index
    %c0_41 = arith.constant 0 : index
    %86 = vector.load %arg9[%c0_40, %c0_41] : memref<2x128xf32, #tpu.memory_space<vmem>>, vector<2x128xf32>
    tpu.vector_store %arg9[%c0_40, %c0_41], %85 {strides = array<i32>} : memref<2x128xf32, #tpu.memory_space<vmem>>, vector<2x128xf32>,
    return
  }
  func.func @transform_0(%arg0: i32) -> (i32, i32) {
    %c0_i32 = arith.constant 0 : i32
    %c0_i32_0 = arith.constant 0 : i32
    %c0_i32_1 = arith.constant 0 : i32
    return %c0_i32, %c0_i32_0 : i32, i32
  }
  func.func @transform_1(%arg0: i32) -> (i32, i32) {
    %c0_i32 = arith.constant 0 : i32
    %c0_i32_0 = arith.constant 0 : i32
    %c0_i32_1 = arith.constant 0 : i32
    return %c0_i32, %c0_i32_0 : i32, i32
  }
  func.func @transform_2(%arg0: i32) -> (i32, i32) {
    %c0_i32 = arith.constant 0 : i32
    %c0_i32_0 = arith.constant 0 : i32
    %c0_i32_1 = arith.constant 0 : i32
    return %c0_i32, %c0_i32_0 : i32, i32
  }
  func.func @transform_3(%arg0: i32) -> (i32, i32, i32) {
    %c0_i32 = arith.constant 0 : i32
    %c0_i32_0 = arith.constant 0 : i32
    %c0_i32_1 = arith.constant 0 : i32
    %c0_i32_2 = arith.constant 0 : i32
    return %c0_i32, %c0_i32_0, %c0_i32_1 : i32, i32, i32
  }
  func.func @transform_4(%arg0: i32) -> (i32, i32, i32) {
    %c0_i32 = arith.constant 0 : i32
    %c0_i32_0 = arith.constant 0 : i32
    %c0_i32_1 = arith.constant 0 : i32
    %c0_i32_2 = arith.constant 0 : i32
    return %c0_i32, %c0_i32_0, %c0_i32_1 : i32, i32, i32
  }
  func.func @transform_5(%arg0: i32) -> (i32, i32) {
    %c0_i32 = arith.constant 0 : i32
    %c0_i32_0 = arith.constant 0 : i32
    %c0_i32_1 = arith.constant 0 : i32
    return %c0_i32, %c0_i32_0 : i32, i32
  }
  func.func @transform_6(%arg0: i32) -> (i32, i32) {
    %c0_i32 = arith.constant 0 : i32
    %c0_i32_0 = arith.constant 0 : i32
    %c0_i32_1 = arith.constant 0 : i32
    return %c0_i32, %c0_i32_0 : i32, i32
  }
  func.func @transform_7(%arg0: i32) -> (i32, i32) {
    %c0_i32 = arith.constant 0 : i32
    %c0_i32_0 = arith.constant 0 : i32
    %c0_i32_1 = arith.constant 0 : i32
    return %c0_i32, %c0_i32_0 : i32, i32
  }
  func.func @transform_8(%arg0: i32) -> (i32, i32) {
    %c0_i32 = arith.constant 0 : i32
    %c0_i32_0 = arith.constant 0 : i32
    %c0_i32_1 = arith.constant 0 : i32
    return %c0_i32, %c0_i32_0 : i32, i32
  }
}

</mosaic_0001>

<bundles_post_ra>
// kernel: gcn_forward.1
= control target key start
LH: loop header
LB: loop body
LE: loop exit
PB: predicated region body
PF: predicated region fallthrough
CT: control target
= control target key end

     0   :  { %13 = vsyncpa [#allocation3], 0  ;;  %s3347_s0 = inlined_call_operand.hbm [shape: s32[16,9], index: 0, kind: input, shape index: {}]   ;;  %s3348_s1 = inlined_call_operand.hbm [shape: bf16[1152,128], index: 1, kind: input, shape index: {}]   ;;  %s3349_s2 = inlined_call_operand.hbm [shape: bf16[16,16], index: 2, kind: input, shape index: {}]   ;;  %s3350_s3 = inlined_call_operand.hbm [shape: bf16[2,128,128], index: 3, kind: input, shape index: {}]   ;;  %s3351_s4 = inlined_call_operand.hbm [shape: f32[2,1,128], index: 4, kind: input, shape index: {}]   ;;  %s3352_s5 = inlined_call_operand.hbm [shape: s32[1,16], index: 5, kind: input, shape index: {}]   ;;  %s3353_s6 = inlined_call_operand.hbm [shape: bf16[128,128], index: 6, kind: input, shape index: {}]   ;;  %s3354_s7 = inlined_call_operand.hbm [shape: f32[1,128], index: 7, kind: input, shape index: {}]   ;;  %s3355_s8 = inlined_call_operand.hbm [shape: f32[2,128], index: 8, kind: output, shape index: {}]  }
   0x1   :  { %14 = vsyncpa [#allocation6], 0 }
   0x2   :  { %15 = vsyncpa [#allocation9], 0 }
   0x3   :  { %16 = vsyncpa [#allocation12], 0 }
   0x4   :  { %17 = vsyncpa [#allocation15], 0 }
   0x5   :  { %18 = vsyncpa [#allocation4], 0  ;;  %s2553_s27 = smov [#allocation5]   ;;  %s2343_s9 = scalar_lea.hbm %s3348_s1, 9216 }
   0x6   :  { %s36_s28 = sshll.u32 %s2553_s27, 4  ;;  %p2344_p0 = scmp.ne.s32.totalorder %s3348_s1, %s2343_s9  ;;  %s37_s28 = int_to_ptr.vmem [resolvable:$true] %s36_s28 }
   0x7   :  { %p2347_p1 = scmp.lt.u32.totalorder %s2343_s9, %s3348_s1 }
   0x9   :  { %p2349_p2 = pnand %p2347_p1, %p2344_p0 }
   0xb   :  { %2352 = shalt.err (!%p2349_p2)
}
   0xc   :  { %s2353_s14 = scalar_lea.vmem %s37_s28, 9216  ;;  %p2358_p4 = scmp.lt.s32.totalorder %s37_s28, %s37_s28 }
   0xd   :  { %p2354_p3 = scmp.ne.s32.totalorder %s37_s28, %s2353_s14  ;;  %p2359_p5 = scmp.lt.s32.totalorder %s2353_s14, %s2353_s14 }
   0xf   :  { %p2360_p6 = por %p2359_p5, %p2358_p4 }
  0x11   :  { %p2361_p7 = pnand %p2360_p6, %p2354_p3 }
  0x13   :  { %2364 = shalt.err (!%p2361_p7)
}
  0x14   :  { %s2554_s15 = smov 64   ;;  %s2555_s16 = smov 4  }
  0x15   :  { %42 = dma.hbm_to_vmem [thread:$0]  %s3348_s1, 9216, %s37_s28, [#allocation6], %s2554_s15, %s2554_s15, %s2555_s16  }
  0x16   :  { %s2556_s19 = smov [#allocation8]   ;;  %s2557_s21 = smov [#allocation11]  }
  0x17   :  { %s60_s20 = sshll.u32 %s2556_s19, 4  ;;  %s85_s22 = sshll.u32 %s2557_s21, 4  ;;  %s61_s20 = int_to_ptr.vmem [resolvable:$true] %s60_s20  ;;  %s86_s22 = int_to_ptr.vmem [resolvable:$true] %s85_s22 }
  0x18   :  { %s2365_s25 = scalar_lea.hbm %s3350_s3, 2048 }
  0x19   :  { %p2366_p8 = scmp.ne.s32.totalorder %s3350_s3, %s2365_s25  ;;  %p2369_p9 = scmp.lt.u32.totalorder %s2365_s25, %s3350_s3 }
  0x1b   :  { %p2371_p10 = pnand %p2369_p9, %p2366_p8 }
  0x1d   :  { %2374 = shalt.err (!%p2371_p10)
}
  0x1e   :  { %s2375_s1 = scalar_lea.vmem %s61_s20, 2048  ;;  %p2380_p12 = scmp.lt.s32.totalorder %s61_s20, %s61_s20 }
  0x1f   :  { %p2376_p11 = scmp.ne.s32.totalorder %s61_s20, %s2375_s1  ;;  %p2381_p13 = scmp.lt.s32.totalorder %s2375_s1, %s2375_s1 }
  0x21   :  { %p2382_p0 = por %p2381_p13, %p2380_p12 }
  0x23   :  { %p2383_p1 = pnand %p2382_p0, %p2376_p11 }
  0x25   :  { %2386 = shalt.err (!%p2383_p1)
}
  0x26   :  { %66 = dma.hbm_to_vmem [thread:$0]  %s3350_s3, 2048, %s61_s20, [#allocation9], %s2554_s15, %s2554_s15, %s2555_s16  }
  0x27   :  { %s2387_s12 = scalar_lea.hbm %s3352_s5, 16 }
  0x28   :  { %p2388_p2 = scmp.ne.s32.totalorder %s3352_s5, %s2387_s12  ;;  %p2391_p3 = scmp.lt.u32.totalorder %s2387_s12, %s3352_s5 }
  0x2a   :  { %p2393_p4 = pnand %p2391_p3, %p2388_p2 }
  0x2c   :  { %2396 = shalt.err (!%p2393_p4)
}
  0x2d   :  { %s2397_s19 = scalar_lea.vmem %s86_s22, 16  ;;  %s2401_s21 = scalar_lea.vmem %s86_s22, 32 }
  0x2e   :  { %p2398_p5 = scmp.ne.s32.totalorder %s86_s22, %s2397_s19  ;;  %p2402_p6 = scmp.lt.s32.totalorder %s86_s22, %s86_s22 }
  0x2f   :  { %p2403_p7 = scmp.lt.s32.totalorder %s2401_s21, %s2397_s19 }
  0x31   :  { %p2404_p8 = por %p2403_p7, %p2402_p6 }
  0x33   :  { %p2405_p9 = pnand %p2404_p8, %p2398_p5 }
  0x35   :  { %2408 = shalt.err (!%p2405_p9)
}
  0x36   :  { %88 = dma.hbm_to_vmem [thread:$0]  %s3352_s5, 16, %s86_s22, [#allocation12]  }
  0x37   :  { %s2558_s23 = smov [#allocation2]   ;;  %s2409_s27 = scalar_lea.hbm %s3347_s0, 256 }
  0x38   :  { %s24_s24 = sshll.u32 %s2558_s23, 4  ;;  %p2410_p10 = scmp.ne.s32.totalorder %s3347_s0, %s2409_s27  ;;  %s25_s24 = int_to_ptr.vmem [resolvable:$true] %s24_s24 }
  0x39   :  { %p2413_p11 = scmp.lt.u32.totalorder %s2409_s27, %s3347_s0 }
  0x3b   :  { %p2415_p12 = pnand %p2413_p11, %p2410_p10 }
  0x3d   :  { %2418 = shalt.err (!%p2415_p12)
}
  0x3e   :  { %s2419_s9 = scalar_lea.vmem %s25_s24, 256  ;;  %p2424_p0 = scmp.lt.s32.totalorder %s25_s24, %s25_s24 }
  0x3f   :  { %p2420_p13 = scmp.ne.s32.totalorder %s25_s24, %s2419_s9  ;;  %p2425_p1 = scmp.lt.s32.totalorder %s2419_s9, %s2419_s9 }
  0x41   :  { %p2426_p2 = por %p2425_p1, %p2424_p0 }
  0x43   :  { %p2427_p3 = pnand %p2426_p2, %p2420_p13 }
  0x45   :  { %2430 = shalt.err (!%p2427_p3)
}
  0x46   :  { %s2559_s5 = smov 128   ;;  %s2560_s22 = smov 8  }
  0x47   :  { %30 = dma.hbm_to_vmem [thread:$0]  %s3347_s0, 256, %s25_s24, [#allocation3], %s2559_s5, %s2559_s5, %s2560_s22  }
  0x48   :  { %s2561_s12 = smov [#allocation7]   ;;  %s2562_s14 = smov [#allocation10]  }
  0x49   :  { %s48_s13 = sshll.u32 %s2561_s12, 4  ;;  %s72_s17 = sshll.u32 %s2562_s14, 4  ;;  %s49_s13 = int_to_ptr.vmem [resolvable:$true] %s48_s13  ;;  %s2678_s17 = int_to_ptr.vmem [resolvable:$true] %s72_s17 }
  0x4a   :  { %s2431_s21 = scalar_lea.hbm %s3349_s2, 128 }
  0x4b   :  { %p2432_p4 = scmp.ne.s32.totalorder %s3349_s2, %s2431_s21  ;;  %p2435_p5 = scmp.lt.u32.totalorder %s2431_s21, %s3349_s2 }
  0x4d   :  { %p2437_p6 = pnand %p2435_p5, %p2432_p4 }
  0x4f   :  { %2440 = shalt.err (!%p2437_p6)
}
  0x50   :  { %s2441_s0 = scalar_lea.vmem %s49_s13, 128  ;;  %p2446_p8 = scmp.lt.s32.totalorder %s49_s13, %s49_s13 }
  0x51   :  { %p2442_p7 = scmp.ne.s32.totalorder %s49_s13, %s2441_s0  ;;  %p2447_p9 = scmp.lt.s32.totalorder %s2441_s0, %s2441_s0 }
  0x53   :  { %p2448_p10 = por %p2447_p9, %p2446_p8 }
  0x55   :  { %p2449_p11 = pnand %p2448_p10, %p2442_p7 }
  0x57   :  { %2452 = shalt.err (!%p2449_p11)
}
  0x58   :  { %54 = dma.hbm_to_vmem [thread:$0]  %s3349_s2, 128, %s49_s13, [#allocation6], %s2554_s15, %s2554_s15, %s2555_s16  }
  0x59   :  { %s2453_s30 = scalar_lea.hbm %s3351_s4, 32 }
  0x5a   :  { %p2454_p12 = scmp.ne.s32.totalorder %s3351_s4, %s2453_s30  ;;  %p2457_p13 = scmp.lt.u32.totalorder %s2453_s30, %s3351_s4 }
  0x5c   :  { %p2459_p0 = pnand %p2457_p13, %p2454_p12 }
  0x5e   :  { %2462 = shalt.err (!%p2459_p0)
}
  0x5f   :  { %s2463_s22 = scalar_lea.vmem %s2678_s17, 32  ;;  %p2468_p2 = scmp.lt.s32.totalorder %s2678_s17, %s2678_s17 }
  0x60   :  { %p2464_p1 = scmp.ne.s32.totalorder %s2678_s17, %s2463_s22  ;;  %p2469_p3 = scmp.lt.s32.totalorder %s2463_s22, %s2463_s22 }
  0x62   :  { %p2470_p4 = por %p2469_p3, %p2468_p2 }
  0x64   :  { %p2471_p5 = pnand %p2470_p4, %p2464_p1 }
  0x66   :  { %2474 = shalt.err (!%p2471_p5)
}
  0x67   :  { %s2563_s2 = smov 16   ;;  %s2564_s10 = smov 1  }
  0x68   :  { %78 = dma.hbm_to_vmem [thread:$0]  %s3351_s4, 32, %s2678_s17, [#allocation9], %s2563_s2, %s2563_s2, %s2564_s10  }
  0x69   :  { %s2565_s13 = smov [#allocation13]   ;;  %s2566_s18 = smov [#allocation14]  }
  0x6a   :  { %s94_s14 = sshll.u32 %s2565_s13, 4  ;;  %s107_s19 = sshll.u32 %s2566_s18, 4  ;;  %s95_s14 = int_to_ptr.vmem [resolvable:$true] %s94_s14  ;;  %s108_s19 = int_to_ptr.vmem [resolvable:$true] %s107_s19 }
  0x6b   :  { %s2475_s20 = scalar_lea.hbm %s3353_s6, 1024 }
  0x6c   :  { %p2476_p6 = scmp.ne.s32.totalorder %s3353_s6, %s2475_s20  ;;  %p2479_p7 = scmp.lt.u32.totalorder %s2475_s20, %s3353_s6 }
  0x6e   :  { %p2481_p8 = pnand %p2479_p7, %p2476_p6 }
  0x70   :  { %2484 = shalt.err (!%p2481_p8)
}
  0x71   :  { %s2485_s4 = scalar_lea.vmem %s95_s14, 1024  ;;  %p2490_p10 = scmp.lt.s32.totalorder %s95_s14, %s95_s14 }
  0x72   :  { %p2486_p9 = scmp.ne.s32.totalorder %s95_s14, %s2485_s4  ;;  %p2491_p11 = scmp.lt.s32.totalorder %s2485_s4, %s2485_s4 }
  0x74   :  { %p2492_p12 = por %p2491_p11, %p2490_p10 }
  0x76   :  { %p2493_p13 = pnand %p2492_p12, %p2486_p9 }
  0x78   :  { %2496 = shalt.err (!%p2493_p13)
}
  0x79   :  { %100 = dma.hbm_to_vmem [thread:$0]  %s3353_s6, 1024, %s95_s14, [#allocation12], %s2554_s15, %s2554_s15, %s2555_s16  }
  0x7a   :  { %s2497_s30 = scalar_lea.hbm %s3354_s7, 16 }
  0x7b   :  { %p2498_p0 = scmp.ne.s32.totalorder %s3354_s7, %s2497_s30  ;;  %p2501_p1 = scmp.lt.u32.totalorder %s2497_s30, %s3354_s7 }
  0x7d   :  { %p2503_p2 = pnand %p2501_p1, %p2498_p0 }
  0x7f   :  { %2506 = shalt.err (!%p2503_p2)
}
  0x80   :  { %s2507_s22 = scalar_lea.vmem %s108_s19, 16  ;;  %s2511_s2 = scalar_lea.vmem %s108_s19, 32 }
  0x81   :  { %p2508_p3 = scmp.ne.s32.totalorder %s108_s19, %s2507_s22  ;;  %p2512_p4 = scmp.lt.s32.totalorder %s108_s19, %s108_s19 }
  0x82   :  { %p2513_p5 = scmp.lt.s32.totalorder %s2511_s2, %s2507_s22 }
  0x84   :  { %p2514_p6 = por %p2513_p5, %p2512_p4 }
  0x86   :  { %p2515_p7 = pnand %p2514_p6, %p2508_p3 }
  0x88   :  { %2518 = shalt.err (!%p2515_p7)
}
  0x89   :  { %110 = dma.hbm_to_vmem [thread:$0]  %s3354_s7, 16, %s108_s19, [#allocation15]  }
  0x8a   :  { %2541 = dma.done.wait [#allocation3], 256  }
  0x8b   :  { %2542 = vsyncadd [#allocation3], 4294967040 }
  0x8c   :  { %2543 = dma.done.wait [#allocation6], 9344  }
  0x8d   :  { %2544 = vsyncadd [#allocation6], 4294957952 }
  0x8e   :  { %2545 = dma.done.wait [#allocation9], 2080  }
  0x8f   :  { %2546 = vsyncadd [#allocation9], 4294965216 }
  0x90   :  { %2547 = dma.done.wait [#allocation12], 1040  }
  0x91   :  { %2548 = vsyncadd [#allocation12], 4294966256 }
  0x92   :  { %2549 = dma.done.wait [#allocation15], 16  }
  0x93   :  { %2550 = vsyncadd [#allocation15], 4294967280  ;;  %v2567_v0 = vmov 1   ;;  %v2568_v1 = vmov 0   ;;  %v2739_v2 = vld [vmem:[#allocation2] sm:$0xff]  ;;  %v2741_v3 = vld [vmem:[#allocation2 + $0x8] sm:$0xff]  ;;  %v136_v45 = vlaneseq }
  0x94   :  { %2231 = vset.pattern.permute.xlu1 %v2567_v0  ;;  %2230 = vset.pattern.permute.xlu0 %v2568_v1  ;;  %v2569_v4 = vmov 2   ;;  %v2570_v5 = vmov 3   ;;  %v2571_v6 = vmov 4   ;;  %v2572_v7 = vmov 5   ;;  %v2244_v8 = vld [vmem:[#allocation5 + $0x40] sm:$0xff]   ;;  %v2248_v12 = vld [vmem:[#allocation5 + $0x48] sm:$0xff]  }
  0x95   :  { %173 = vperm.xlu1 %2231, %v2739_v2   ;;  %149 = vperm.xlu0 %2230, %v2739_v2   ;;  %v2245_v9 = vld [vmem:[#allocation5 + $0xc0] sm:$0xff]   ;;  %v2249_v13 = vld [vmem:[#allocation5 + $0xc8] sm:$0xff]   ;;  %v2573_v15 = vmov 6   ;;  %v2252_v17 = vld [vmem:[#allocation5 + $0x50] sm:$0xff]   ;;  %v2574_v22 = vmov 8   ;;  %v2575_v30 = vmov 7  }
  0x96   :  { %v2246_v10 = vld [vmem:[#allocation5] sm:$0xff]   ;;  %1976 = vmatprep.subr.bf16.mxu0 %v2244_v8  ;;  %1998 = vmatprep.subr.bf16.mxu1 %v2245_v9  ;;  %v2250_v14 = vld [vmem:[#allocation5 + $0x8] sm:$0xff]   ;;  %v2253_v18 = vld [vmem:[#allocation5 + $0xd0] sm:$0xff]   ;;  %v2762_v46 = vand.u32 127, %v136_v45  ;;  %v3356_v55 = vmov 0  ;;  %v3358_v56 = vmov 0 }
  0x97   :  { %v2247_v11 = vld [vmem:[#allocation5 + $0x80] sm:$0xff]   ;;  %1977 = vmatpush3.bf16.msra.mxu0 %v2246_v10  ;;  %v2251_v16 = vld [vmem:[#allocation5 + $0x88] sm:$0xff]   ;;  %v2254_v19 = vld [vmem:[#allocation5 + $0x10] sm:$0xff]   ;;  %v3366_v63 = vmov 0  ;;  %s2578_s7 = smov [#allocation16]  }
  0x98   :  { %1999 = vmatpush3.bf16.msra.mxu1 %v2247_v11  ;;  %1978 = vmatprep.subr.bf16.mxu0 %v2248_v12  ;;  %v2255_v20 = vld [vmem:[#allocation5 + $0x90] sm:$0xff]   ;;  %v2256_v21 = vld [vmem:[#allocation5 + $0x58] sm:$0xff]   ;;  %v2260_v26 = vld [vmem:[#allocation5 + $0x60] sm:$0xff]   ;;  %v2769_v49 = vadd.s32 128, %v2762_v46  ;;  %v2776_v52 = vadd.s32 384, %v2762_v46  ;;  %v2949_v12 = vadd.s32 256, %v2762_v46 }
  0x99   :  { %176 = vperm.xlu1 %2231, %v2741_v3   ;;  %152 = vperm.xlu0 %2230, %v2741_v3   ;;  %v2257_v23 = vld [vmem:[#allocation5 + $0xd8] sm:$0xff]   ;;  %v2261_v27 = vld [vmem:[#allocation5 + $0xe0] sm:$0xff]   ;;  %v2264_v31 = vld [vmem:[#allocation5 + $0x68] sm:$0xff]   ;;  %v3127_v9 = vadd.s32 896, %v2762_v46  ;;  %s1840_s16 = sshll.u32 %s2578_s7, 4  ;;  %s1841_s16 = int_to_ptr.vmem [resolvable:$true] %s1840_s16 }
  0x9a   :  { %2000 = vmatprep.subr.bf16.mxu1 %v2249_v13  ;;  %v2258_v24 = vld [vmem:[#allocation5 + $0x18] sm:$0xff]   ;;  %v2262_v28 = vld [vmem:[#allocation5 + $0x20] sm:$0xff]   ;;  %v2265_v32 = vld [vmem:[#allocation5 + $0xe8] sm:$0xff]   ;;  %s2519_s10 = scalar_lea.vmem %s1841_s16, 32  ;;  %p2524_p9 = scmp.lt.s32.totalorder %s1841_s16, %s1841_s16 }
  0x9b   :  { %1979 = vmatpush3.bf16.msra.mxu0 %v2250_v14  ;;  %v2259_v25 = vld [vmem:[#allocation5 + $0x98] sm:$0xff]   ;;  %v2263_v29 = vld [vmem:[#allocation5 + $0xa0] sm:$0xff]   ;;  %v2266_v33 = vld [vmem:[#allocation5 + $0x28] sm:$0xff]   ;;  %v3386_v14 = vmov 0  ;;  %p2520_p8 = scmp.ne.s32.totalorder %s1841_s16, %s2519_s10  ;;  %p2525_p10 = scmp.lt.s32.totalorder %s2519_s10, %s2519_s10 }
  0x9c   :  { %2001 = vmatpush3.bf16.msra.mxu1 %v2251_v16  ;;  %1980 = vmatprep.subr.bf16.mxu0 %v2252_v17  ;;  %v2267_v34 = vld [vmem:[#allocation5 + $0xa8] sm:$0xff]   ;;  %v2268_v35 = vld [vmem:[#allocation5 + $0x70] sm:$0xff]   ;;  %v2272_v39 = vld [vmem:[#allocation5 + $0x78] sm:$0xff]   ;;  %v3390_v16 = vmov 0 }
  0x9d   :  { %2233 = vset.pattern.permute.xlu1 %v2569_v4  ;;  %2232 = vset.pattern.permute.xlu0 %v2569_v4  ;;  %v2269_v36 = vld [vmem:[#allocation5 + $0xf0] sm:$0xff]   ;;  %v2273_v40 = vld [vmem:[#allocation5 + $0xf8] sm:$0xff]   ;;  %v2276_v43 = vld [vmem:[#allocation5 + $0x140] sm:$0xff]   ;;  %p2526_p11 = por %p2525_p10, %p2524_p9 }
  0x9e   :  { %218 = vperm.xlu1 %2233, %v2741_v3   ;;  %215 = vperm.xlu0 %2232, %v2739_v2   ;;  %v2270_v37 = vld [vmem:[#allocation5 + $0x30] sm:$0xff]   ;;  %v2274_v41 = vld [vmem:[#allocation5 + $0x38] sm:$0xff]   ;;  %v2277_v44 = vld [vmem:[#allocation5 + $0x1c0] sm:$0xff]  }
  0x9f   :  { %2002 = vmatprep.subr.bf16.mxu1 %v2253_v18  ;;  %1981 = vmatpush3.bf16.msra.mxu0 %v2254_v19  ;;  %v2271_v38 = vld [vmem:[#allocation5 + $0xb0] sm:$0xff]   ;;  %v2275_v42 = vld [vmem:[#allocation5 + $0xb8] sm:$0xff]   ;;  %v2281_v59 = vld [vmem:[#allocation5 + $0x1c8] sm:$0xff]   ;;  %p2527_p12 = pnand %p2526_p11, %p2520_p8 }
  0xa0   :  { %2003 = vmatpush3.bf16.msra.mxu1 %v2255_v20  ;;  %1982 = vmatprep.subr.bf16.mxu0 %v2256_v21  ;;  %v2294_v62 = vld [vmem:[#allocation5 + $0x120] sm:$0xff]   ;;  %v2283_v0 = vld [vmem:[#allocation5 + $0x188] sm:$0xff]   ;;  %v2287_v10 = vld [vmem:[#allocation5 + $0x190] sm:$0xff]  }
  0xa1   :  { %2004 = vmatprep.subr.bf16.mxu1 %v2257_v23  ;;  %v2289_v11 = vld [vmem:[#allocation5 + $0x1d8] sm:$0xff]   ;;  %v2295_v23 = vld [vmem:[#allocation5 + $0x1a0] sm:$0xff]  }
  0xa2   :  { %2234 = vset.pattern.permute.xlu1 %v2570_v5  ;;  %2235 = vset.pattern.permute.xlu0 %v2570_v5  ;;  %v2306_v18 = vld [vmem:[#allocation5 + $0x138] sm:$0xff]  }
  0xa3   :  { %257 = vperm.xlu1 %2234, %v2739_v2   ;;  %260 = vperm.xlu0 %2235, %v2741_v3  }
  0xa4   :  { %1983 = vmatpush3.bf16.msra.mxu0 %v2258_v24  ;;  %2005 = vmatpush3.bf16.msra.mxu1 %v2259_v25  ;;  %v2576_v25 = vmov 0.0   ;;  %v2297_v24 = vld [vmem:[#allocation5 + $0x1e8] sm:$0xff]  }
  0xa5   :  { %1984 = vmatprep.subr.bf16.mxu0 %v2260_v26  ;;  %2006 = vmatprep.subr.bf16.mxu1 %v2261_v27 }
  0xa7   :  { %2236 = vset.pattern.permute.xlu1 %v2571_v6  ;;  %2237 = vset.pattern.permute.xlu0 %v2572_v7  ;;  %v3375_v6 = vmov 0 }
  0xa8   :  { %299 = vperm.xlu1 %2236, %v2739_v2   ;;  %341 = vperm.xlu0 %2237, %v2739_v2  }
  0xa9   :  { %1985 = vmatpush3.bf16.msra.mxu0 %v2262_v28  ;;  %2007 = vmatpush3.bf16.msra.mxu1 %v2263_v29 }
  0xaa   :  { %1986 = vmatprep.subr.bf16.mxu0 %v2264_v31  ;;  %2008 = vmatprep.subr.bf16.mxu1 %v2265_v32  ;;  %v3058_v32 = vadd.s32 640, %v2762_v46 }
  0xac   :  { %302 = vperm.xlu1 %2236, %v2741_v3   ;;  %2240 = vset.pattern.permute.xlu0 %v2573_v15 }
  0xad   :  { %386 = vperm.xlu0 %2240, %v2741_v3   ;;  %1987 = vmatpush3.bf16.msra.mxu0 %v2266_v33 }
  0xae   :  { %2009 = vmatpush3.bf16.msra.mxu1 %v2267_v34  ;;  %1988 = vmatprep.subr.bf16.mxu0 %v2268_v35  ;;  %v2278_v35 = vld [vmem:[#allocation5 + $0x100] sm:$0xff]  }
  0xaf   :  { %2010 = vmatprep.subr.bf16.mxu1 %v2269_v36 }
  0xb0   :  { %2238 = vset.pattern.permute.xlu1 %v2572_v7 }
  0xb1   :  { %344 = vperm.xlu1 %2238, %v2741_v3   ;;  %2242 = vset.pattern.permute.xlu0 %v2574_v22 }
  0xb2   :  { %467 = vperm.xlu0 %2242, %v2739_v2   ;;  %1989 = vmatpush3.bf16.msra.mxu0 %v2270_v37  ;;  %v2280_v37 = vld [vmem:[#allocation5 + $0x148] sm:$0xff]  }
  0xb3   :  { %2011 = vmatpush3.bf16.msra.mxu1 %v2271_v38  ;;  %1990 = vmatprep.subr.bf16.mxu0 %v2272_v39  ;;  %v2282_v38 = vld [vmem:[#allocation5 + $0x108] sm:$0xff]   ;;  %v2284_v39 = vld [vmem:[#allocation5 + $0x150] sm:$0xff]  }
  0xb4   :  { %2012 = vmatprep.subr.bf16.mxu1 %v2273_v40  ;;  %v2309_v40 = vld [vmem:[#allocation5 + $0x208] sm:$0xff]  }
  0xb5   :  { %2239 = vset.pattern.permute.xlu1 %v2573_v15  ;;  %v3388_v15 = vmov 0 }
  0xb6   :  { %383 = vperm.xlu1 %2239, %v2739_v2   ;;  %1991 = vmatpush3.bf16.msra.mxu0 %v2274_v41  ;;  %v2286_v41 = vld [vmem:[#allocation5 + $0x110] sm:$0xff]  }
  0xb7   :  { %2013 = vmatpush3.bf16.msra.mxu1 %v2275_v42  ;;  %2020 = vmatprep.subr.bf16.mxu0 %v2276_v43  ;;  %v2288_v42 = vld [vmem:[#allocation5 + $0x158] sm:$0xff]  }
  0xb8   :  { %2042 = vmatprep.subr.bf16.mxu1 %v2277_v44  ;;  %v2290_v43 = vld [vmem:[#allocation5 + $0x118] sm:$0xff]   ;;  %v2292_v44 = vld [vmem:[#allocation5 + $0x160] sm:$0xff]  }
  0xba   :  { %2241 = vset.pattern.permute.xlu1 %v2575_v30 }
  0xbb   :  { %425 = vperm.xlu1 %2241, %v2739_v2   ;;  %v3370_v2 = vmov 0 }
  0xbf   :  { %428 = vperm.xlu1 %2241, %v2741_v3  }
  0xc3   :  { %2243 = vset.pattern.permute.xlu1 %v2574_v22 }
  0xc4   :  { %470 = vperm.xlu1 %2243, %v2741_v3   ;;  %v3372_v3 = vmov 0 }
 0x114   :  { %v2764_v47 = vpop.permute.xlu1 %173  ;;  %v2766_v48 = vpop.permute.xlu0 %149 }
 0x115   :  { %vm155_vm0 = vcmp.eq.s32.totalorder %v2766_v48, %v2769_v49  ;;  %vm179_vm1 = vcmp.eq.s32.totalorder %v2764_v47, %v2769_v49  ;;  %vm157_vm2 = vcmp.eq.s32.totalorder %v2766_v48, %v2776_v52  ;;  %vm181_vm3 = vcmp.eq.s32.totalorder %v2764_v47, %v2776_v52 }
 0x116   :  { %vm154_vm4 = vcmp.eq.s32.totalorder %v2766_v48, %v2762_v46  ;;  %vm178_vm5 = vcmp.eq.s32.totalorder %v2764_v47, %v2762_v46  ;;  %vm197_vm8 = vmor %vm155_vm0, %vm179_vm1 }
 0x117   :  { %vm2802_vm11 = vmor %vm157_vm2, %vm181_vm3 }
 0x118   :  { %v2771_v50 = vpop.permute.xlu1 %176  ;;  %v2773_v51 = vpop.permute.xlu0 %152  ;;  %v3357_v55 = vsel %vm2802_vm11, 4294967295, %v3356_v55  ;;  %vm2808_vm13 = vmor %vm154_vm4, %vm178_vm5 }
 0x119   :  { %vm164_vm6 = vcmp.eq.s32.totalorder %v2773_v51, %v2769_v49  ;;  %vm188_vm7 = vcmp.eq.s32.totalorder %v2771_v50, %v2769_v49  ;;  %vm166_vm9 = vcmp.eq.s32.totalorder %v2773_v51, %v2776_v52  ;;  %vm190_vm10 = vcmp.eq.s32.totalorder %v2771_v50, %v2776_v52 }
 0x11a   :  { %v3359_v56 = vsel %vm2808_vm13, 4294967295, %v3358_v56  ;;  %vm206_vm14 = vmor %vm164_vm6, %vm188_vm7  ;;  %vm163_vm0 = vcmp.eq.s32.totalorder %v2773_v51, %v2762_v46  ;;  %vm187_vm1 = vcmp.eq.s32.totalorder %v2771_v50, %v2762_v46 }
 0x11b   :  { %vm208_vm2 = vmor %vm166_vm9, %vm190_vm10  ;;  %vm3362_vm9 = vnez %v3357_v55  ;;  %v2279_v55 = vld [vmem:[#allocation5 + $0x180] sm:$0xff]  }
 0x11c   :  { %vm2828_vm13 = vmor %vm163_vm0, %vm187_vm1 }
 0x11d   :  { %v2786_v53 = vpop.permute.xlu1 %218  ;;  %v2788_v54 = vpop.permute.xlu0 %215 }
 0x11e   :  { %vm221_vm12 = vcmp.eq.s32.totalorder %v2788_v54, %v2769_v49  ;;  %vm230_vm15 = vcmp.eq.s32.totalorder %v2786_v53, %v2769_v49  ;;  %vm223_vm3 = vcmp.eq.s32.totalorder %v2788_v54, %v2776_v52  ;;  %vm232_vm5 = vcmp.eq.s32.totalorder %v2786_v53, %v2776_v52 }
 0x11f   :  { %vm239_vm4 = vmor %vm197_vm8, %vm221_vm12  ;;  %vm220_vm8 = vcmp.eq.s32.totalorder %v2788_v54, %v2762_v46 }
 0x120   :  { %vm248_vm6 = vmor %vm206_vm14, %vm230_vm15 }
 0x121   :  { %vm241_vm10 = vmor %vm3362_vm9, %vm223_vm3 }
 0x122   :  { %v2818_v57 = vpop.permute.xlu1 %257  ;;  %v2820_v58 = vpop.permute.xlu0 %260  ;;  %vm250_vm12 = vmor %vm208_vm2, %vm232_vm5  ;;  %vm3365_vm2 = vnez %v3359_v56 }
 0x123   :  { %vm263_vm7 = vcmp.eq.s32.totalorder %v2818_v57, %v2769_v49  ;;  %vm272_vm11 = vcmp.eq.s32.totalorder %v2820_v58, %v2769_v49  ;;  %vm265_vm14 = vcmp.eq.s32.totalorder %v2818_v57, %v2776_v52  ;;  %vm274_vm0 = vcmp.eq.s32.totalorder %v2820_v58, %v2776_v52  ;;  %vm2854_vm5 = vmor %vm3365_vm2, %vm220_vm8 }
 0x124   :  { %vm281_vm15 = vmor %vm239_vm4, %vm263_vm7  ;;  %v3367_v63 = vsel %vm2854_vm5, 4294967295, %v3366_v63 }
 0x125   :  { %vm2846_vm1 = vmor %vm248_vm6, %vm272_vm11  ;;  %vm229_vm11 = vcmp.eq.s32.totalorder %v2786_v53, %v2762_v46 }
 0x126   :  { %vm283_vm9 = vmor %vm241_vm10, %vm265_vm14 }
 0x127   :  { %v2840_v60 = vpop.permute.xlu1 %299  ;;  %v2844_v61 = vpop.permute.xlu0 %341  ;;  %vm2860_vm7 = vmor %vm250_vm12, %vm274_vm0 }
 0x128   :  { %vm305_vm3 = vcmp.eq.s32.totalorder %v2840_v60, %v2769_v49  ;;  %vm307_vm4 = vcmp.eq.s32.totalorder %v2840_v60, %v2776_v52  ;;  %vm347_vm8 = vcmp.eq.s32.totalorder %v2844_v61, %v2769_v49  ;;  %vm349_vm14 = vcmp.eq.s32.totalorder %v2844_v61, %v2776_v52  ;;  %vm247_vm0 = vmor %vm2828_vm13, %vm229_vm11 }
 0x129   :  { %vm323_vm6 = vmor %vm281_vm15, %vm305_vm3  ;;  %vm262_vm15 = vcmp.eq.s32.totalorder %v2818_v57, %v2762_v46  ;;  %vm304_vm11 = vcmp.eq.s32.totalorder %v2840_v60, %v2762_v46 }
 0x12a   :  { %vm325_vm10 = vmor %vm283_vm9, %vm307_vm4  ;;  %vm271_vm4 = vcmp.eq.s32.totalorder %v2820_v58, %v2762_v46 }
 0x12b   :  { %v2866_v1 = vpop.permute.xlu1 %302  ;;  %vm2878_vm5 = vmor %vm323_vm6, %vm347_vm8  ;;  %vm3374_vm6 = vnez %v3367_v63  ;;  %v2296_v63 = vld [vmem:[#allocation5 + $0x168] sm:$0xff]  }
 0x12c   :  { %vm314_vm2 = vcmp.eq.s32.totalorder %v2866_v1, %v2769_v49  ;;  %vm316_vm12 = vcmp.eq.s32.totalorder %v2866_v1, %v2776_v52  ;;  %v3371_v2 = vsel %vm2878_vm5, 4294967295, %v3370_v2  ;;  %vm2886_vm9 = vmor %vm325_vm10, %vm349_vm14  ;;  %v2898_v5 = vpop.permute.xlu0 %386  ;;  %vm313_vm14 = vcmp.eq.s32.totalorder %v2866_v1, %v2762_v46 }
 0x12d   :  { %vm332_vm3 = vmor %vm2846_vm1, %vm314_vm2  ;;  %v3373_v3 = vsel %vm2886_vm9, 4294967295, %v3372_v3 }
 0x12e   :  { %vm334_vm13 = vmor %vm2860_vm7, %vm316_vm12  ;;  %vm398_vm12 = vcmp.eq.s32.totalorder %v2898_v5, %v2769_v49 }
 0x12f   :  { %vm280_vm8 = vmor %vm3374_vm6, %vm262_vm15  ;;  %vm400_vm15 = vcmp.eq.s32.totalorder %v2898_v5, %v2776_v52  ;;  %vm346_vm6 = vcmp.eq.s32.totalorder %v2844_v61, %v2762_v46 }
 0x130   :  { %v2892_v4 = vpop.permute.xlu1 %344  ;;  %vm289_vm10 = vmor %vm247_vm0, %vm271_vm4 }
 0x131   :  { %vm356_vm1 = vcmp.eq.s32.totalorder %v2892_v4, %v2769_v49  ;;  %vm358_vm2 = vcmp.eq.s32.totalorder %v2892_v4, %v2776_v52  ;;  %vm2908_vm9 = vmor %vm280_vm8, %vm304_vm11  ;;  %v2924_v8 = vpop.permute.xlu0 %467 }
 0x132   :  { %v3376_v6 = vsel %vm2908_vm9, 4294967295, %v3375_v6  ;;  %vm374_vm7 = vmor %vm332_vm3, %vm356_vm1  ;;  %vm3377_vm3 = vnez %v3371_v2  ;;  %v2285_v2 = vld [vmem:[#allocation5 + $0x1d0] sm:$0xff]  }
 0x133   :  { %vm376_vm5 = vmor %vm334_vm13, %vm358_vm2  ;;  %vm355_vm13 = vcmp.eq.s32.totalorder %v2892_v4, %v2762_v46  ;;  %vm3380_vm2 = vnez %v3373_v3  ;;  %v2298_v3 = vld [vmem:[#allocation5 + $0x128] sm:$0xff]  }
 0x134   :  { %vm331_vm11 = vmor %vm289_vm10, %vm313_vm14 }
 0x135   :  { %v2914_v7 = vpop.permute.xlu1 %383  ;;  %vm2928_vm8 = vmor %vm374_vm7, %vm398_vm12  ;;  %vm3385_vm7 = vnez %v3376_v6  ;;  %v2300_v6 = vld [vmem:[#allocation5 + $0x170] sm:$0xff]  }
 0x136   :  { %vm389_vm0 = vcmp.eq.s32.totalorder %v2914_v7, %v2769_v49  ;;  %vm391_vm4 = vcmp.eq.s32.totalorder %v2914_v7, %v2776_v52  ;;  %vm2940_vm10 = vmor %vm376_vm5, %vm400_vm15  ;;  %vm388_vm14 = vcmp.eq.s32.totalorder %v2914_v7, %v2762_v46 }
 0x137   :  { %vm407_vm1 = vmor %vm3377_vm3, %vm389_vm0  ;;  %vm473_vm0 = vcmp.eq.s32.totalorder %v2924_v8, %v2769_v49 }
 0x138   :  { %vm2936_vm9 = vmor %vm3380_vm2, %vm391_vm4  ;;  %vm475_vm2 = vcmp.eq.s32.totalorder %v2924_v8, %v2776_v52 }
 0x139   :  { %vm364_vm12 = vmor %vm3385_vm7, %vm346_vm6 }
 0x13a   :  { %v2951_v13 = vpop.permute.xlu1 %425  ;;  %vm2955_vm4 = vmor %vm331_vm11, %vm355_vm13  ;;  %vm156_vm11 = vcmp.eq.s32.totalorder %v2766_v48, %v2949_v12  ;;  %vm180_vm13 = vcmp.eq.s32.totalorder %v2764_v47, %v2949_v12 }
 0x13b   :  { %v3387_v14 = vsel %vm2955_vm4, 4294967295, %v3386_v14  ;;  %vm431_vm5 = vcmp.eq.s32.totalorder %v2951_v13, %v2769_v49  ;;  %vm433_vm15 = vcmp.eq.s32.totalorder %v2951_v13, %v2776_v52  ;;  %vm2963_vm3 = vmor %vm364_vm12, %vm388_vm14  ;;  %vm189_vm12 = vcmp.eq.s32.totalorder %v2771_v50, %v2949_v12 }
 0x13c   :  { %v3389_v15 = vsel %vm2963_vm3, 4294967295, %v3388_v15  ;;  %vm449_vm6 = vmor %vm407_vm1, %vm431_vm5  ;;  %vm165_vm1 = vcmp.eq.s32.totalorder %v2773_v51, %v2949_v12 }
 0x13d   :  { %vm2969_vm7 = vmor %vm449_vm6, %vm473_vm0 }
 0x13e   :  { %v3391_v16 = vsel %vm2969_vm7, 4294967295, %v3390_v16  ;;  %v2977_v17 = vpop.permute.xlu1 %428  ;;  %vm451_vm14 = vmor %vm2936_vm9, %vm433_vm15  ;;  %vm397_vm7 = vcmp.eq.s32.totalorder %v2898_v5, %v2762_v46  ;;  %vm430_vm15 = vcmp.eq.s32.totalorder %v2951_v13, %v2762_v46 }
 0x13f   :  { %vm440_vm0 = vcmp.eq.s32.totalorder %v2977_v17, %v2769_v49  ;;  %vm442_vm5 = vcmp.eq.s32.totalorder %v2977_v17, %v2776_v52  ;;  %vm2989_vm6 = vmor %vm451_vm14, %vm475_vm2  ;;  %vm439_vm2 = vcmp.eq.s32.totalorder %v2977_v17, %v2762_v46 }
 0x140   :  { %vm458_vm9 = vmor %vm2928_vm8, %vm440_vm0  ;;  %vm3400_vm8 = vnez %v3387_v14  ;;  %v1856_v29 = vsel %vm2989_vm6, 1.0, %v2576_v25  ;;  %v2304_v14 = vld [vmem:[#allocation5 + $0x178] sm:$0xff]  }
 0x141   :  { %vm2999_vm3 = vmor %vm156_vm11, %vm180_vm13  ;;  %vm3401_vm11 = vnez %v3389_v15  ;;  %v2291_v15 = vld [vmem:[#allocation5 + $0x198] sm:$0xff]  }
 0x142   :  { %vm3005_vm4 = vmor %vm2940_vm10, %vm442_vm5 }
 0x143   :  { %vm3011_vm14 = vmor %vm165_vm1, %vm189_vm12  ;;  %v3017_v22 = vpop.permute.xlu1 %470 }
 0x144   :  { %vm415_vm0 = vmor %vm3400_vm8, %vm397_vm7  ;;  %vm482_vm10 = vcmp.eq.s32.totalorder %v3017_v22, %v2769_v49  ;;  %vm484_vm1 = vcmp.eq.s32.totalorder %v3017_v22, %v2776_v52  ;;  %vm472_vm7 = vcmp.eq.s32.totalorder %v2924_v8, %v2762_v46  ;;  %vm3406_vm8 = vnez %v3391_v16  ;;  %v2293_v16 = vld [vmem:[#allocation5 + $0x1e0] sm:$0xff]  }
 0x145   :  { %vm3021_vm13 = vmor %vm3401_vm11, %vm430_vm15  ;;  %vm481_vm15 = vcmp.eq.s32.totalorder %v3017_v22, %v2762_v46  ;;  %v1854_v26 = vsel %vm3406_vm8, 1.0, %v2576_v25  ;;  %vm231_vm11 = vcmp.eq.s32.totalorder %v2786_v53, %v2949_v12  ;;  %vm159_vm8 = vcmp.eq.s32.totalorder %v2766_v48, %v3058_v32 }
 0x146   :  { %vm3029_vm12 = vmor %vm415_vm0, %vm439_vm2  ;;  %vm222_vm0 = vcmp.eq.s32.totalorder %v2788_v54, %v2949_v12 }
 0x147   :  { %vm500_vm5 = vmor %vm458_vm9, %vm482_vm10  ;;  %vm264_vm10 = vcmp.eq.s32.totalorder %v2818_v57, %v2949_v12 }
 0x148   :  { %v1863_v27 = vsel %vm500_vm5, 1.0, %v2576_v25  ;;  %vm502_vm2 = vmor %vm3005_vm4, %vm484_vm1  ;;  %vm315_vm5 = vcmp.eq.s32.totalorder %v2866_v1, %v2949_v12 }
 0x149   :  { %v545_v28 = vpack.c.bf16 %v1863_v27, %v1854_v26  ;;  %v1865_v30 = vsel %vm502_vm2, 1.0, %v2576_v25  ;;  %vm490_vm9 = vmor %vm3021_vm13, %vm472_vm7  ;;  %vm273_vm13 = vcmp.eq.s32.totalorder %v2820_v58, %v2949_v12  ;;  %vm183_vm2 = vcmp.eq.s32.totalorder %v2764_v47, %v3058_v32  ;;  %v2299_v26 = vld [vmem:[#allocation5 + $0x1a8] sm:$0xff]   ;;  %v2301_v27 = vld [vmem:[#allocation5 + $0x1f0] sm:$0xff]  }
 0x14a   :  { %v547_v31 = vpack.c.bf16 %v1865_v30, %v1856_v29  ;;  %vm499_vm4 = vmor %vm3029_vm12, %vm481_vm15  ;;  %v1853_v33 = vsel %vm490_vm9, 1.0, %v2576_v25  ;;  %vm306_vm12 = vcmp.eq.s32.totalorder %v2840_v60, %v2949_v12  ;;  %v141_v29 = vadd.s32 512, %v2762_v46  ;;  %v2305_v30 = vld [vmem:[#allocation5 + $0x1f8] sm:$0xff]  }
 0x14b   :  { %1161 = vmatprep.mubr.bf16.mxu0 %v545_v28  ;;  %v1862_v34 = vsel %vm499_vm4, 1.0, %v2576_v25  ;;  %vm240_vm6 = vmor %vm2999_vm3, %vm222_vm0  ;;  %vm348_vm3 = vcmp.eq.s32.totalorder %v2844_v61, %v2949_v12  ;;  %vm357_vm0 = vcmp.eq.s32.totalorder %v2892_v4, %v2949_v12  ;;  %v2303_v28 = vld [vmem:[#allocation5 + $0x1b0] sm:$0xff]  }
 0x14c   :  { %1202 = vmatprep.mubr.bf16.mxu1 %v547_v31  ;;  %v544_v36 = vpack.c.bf16 %v1862_v34, %v1853_v33  ;;  %vm249_vm1 = vmor %vm3011_vm14, %vm231_vm11  ;;  %vm390_vm11 = vcmp.eq.s32.totalorder %v2914_v7, %v2949_v12  ;;  %v2307_v31 = vld [vmem:[#allocation5 + $0x1b8] sm:$0xff]  }
 0x14d   :  { %vm282_vm7 = vmor %vm240_vm6, %vm264_vm10  ;;  %vm399_vm10 = vcmp.eq.s32.totalorder %v2898_v5, %v2949_v12 }
 0x14e   :  { %1162 = vmatmul.mubr.bf16.vlgmr.msra.gmra.mrb[0].mxu0 %v544_v36  ;;  %vm291_vm15 = vmor %vm249_vm1, %vm273_vm13  ;;  %vm432_vm1 = vcmp.eq.s32.totalorder %v2951_v13, %v2949_v12 }
 0x14f   :  { %vm324_vm14 = vmor %vm282_vm7, %vm306_vm12  ;;  %2021 = vmatpush3.bf16.msra.mxu0 %v2278_v35  ;;  %vm441_vm7 = vcmp.eq.s32.totalorder %v2977_v17, %v2949_v12  ;;  %v3197_v35 = vadd.s32 768, %v2762_v46 }
 0x150   :  { %vm333_vm9 = vmor %vm291_vm15, %vm315_vm5  ;;  %2022 = vmatprep.subr.bf16.mxu0 %v2280_v37  ;;  %vm474_vm15 = vcmp.eq.s32.totalorder %v2924_v8, %v2949_v12 }
 0x151   :  { %vm366_vm4 = vmor %vm324_vm14, %vm348_vm3  ;;  %vm168_vm14 = vcmp.eq.s32.totalorder %v2773_v51, %v3058_v32 }
 0x152   :  { %vm3084_vm6 = vmor %vm159_vm8, %vm183_vm2  ;;  %vm483_vm8 = vcmp.eq.s32.totalorder %v3017_v22, %v2949_v12  ;;  %v2302_v12 = vld [vmem:[#allocation5 + $0x130] sm:$0xff]  }
 0x153   :  { %vm375_vm13 = vmor %vm333_vm9, %vm357_vm0  ;;  %2023 = vmatpush3.bf16.msra.mxu0 %v2282_v38  ;;  %vm192_vm0 = vcmp.eq.s32.totalorder %v2771_v50, %v3058_v32  ;;  %v2308_v38 = vld [vmem:[#allocation5 + $0x200] sm:$0xff]  }
 0x154   :  { %vm408_vm12 = vmor %vm366_vm4, %vm390_vm11  ;;  %2024 = vmatprep.subr.bf16.mxu0 %v2284_v39  ;;  %vm225_vm11 = vcmp.eq.s32.totalorder %v2788_v54, %v3058_v32 }
 0x155   :  { %vm417_vm5 = vmor %vm375_vm13, %vm399_vm10  ;;  %vm234_vm10 = vcmp.eq.s32.totalorder %v2786_v53, %v3058_v32 }
 0x156   :  { %vm450_vm3 = vmor %vm408_vm12, %vm432_vm1  ;;  %vm267_vm1 = vcmp.eq.s32.totalorder %v2818_v57, %v3058_v32 }
 0x157   :  { %vm459_vm2 = vmor %vm417_vm5, %vm441_vm7  ;;  %2025 = vmatpush3.bf16.msra.mxu0 %v2286_v41  ;;  %vm276_vm7 = vcmp.eq.s32.totalorder %v2820_v58, %v3058_v32  ;;  %v2310_v41 = vld [vmem:[#allocation5 + $0x210] sm:$0xff]  }
 0x158   :  { %vm492_vm9 = vmor %vm450_vm3, %vm474_vm15  ;;  %2026 = vmatprep.subr.bf16.mxu0 %v2288_v42  ;;  %vm309_vm15 = vcmp.eq.s32.totalorder %v2840_v60, %v3058_v32  ;;  %v3239_v42 = vadd.s32 1024, %v2762_v46 }
 0x159   :  { %vm501_vm4 = vmor %vm459_vm2, %vm483_vm8  ;;  %v1855_v49 = vsel %vm492_vm9, 1.0, %v2576_v25  ;;  %vm318_vm8 = vcmp.eq.s32.totalorder %v2866_v1, %v3058_v32 }
 0x15a   :  { %v1864_v52 = vsel %vm501_vm4, 1.0, %v2576_v25  ;;  %vm210_vm13 = vmor %vm168_vm14, %vm192_vm0  ;;  %vm360_vm0 = vcmp.eq.s32.totalorder %v2892_v4, %v3058_v32 }
 0x15b   :  { %v546_v56 = vpack.c.bf16 %v1864_v52, %v1855_v49  ;;  %vm243_vm12 = vmor %vm3084_vm6, %vm225_vm11  ;;  %2027 = vmatpush3.bf16.msra.mxu0 %v2290_v43  ;;  %vm351_vm6 = vcmp.eq.s32.totalorder %v2844_v61, %v3058_v32  ;;  %vm393_vm11 = vcmp.eq.s32.totalorder %v2914_v7, %v3058_v32  ;;  %v2311_v43 = vld [vmem:[#allocation5 + $0x218] sm:$0xff]  }
 0x15c   :  { %vm252_vm5 = vmor %vm210_vm13, %vm234_vm10  ;;  %2028 = vmatprep.subr.bf16.mxu0 %v2292_v44  ;;  %vm402_vm10 = vcmp.eq.s32.totalorder %v2898_v5, %v3058_v32 }
 0x15d   :  { %1203 = vmatmul.mubr.bf16.vlgmr.msra.gmra.mrb[0].mxu1 %v546_v56  ;;  %vm285_vm3 = vmor %vm243_vm12, %vm267_vm1  ;;  %vm435_vm1 = vcmp.eq.s32.totalorder %v2951_v13, %v3058_v32 }
 0x15e   :  { %2043 = vmatpush3.bf16.msra.mxu1 %v2279_v55  ;;  %vm294_vm2 = vmor %vm252_vm5, %vm276_vm7  ;;  %vm444_vm7 = vcmp.eq.s32.totalorder %v2977_v17, %v3058_v32 }
 0x15f   :  { %vm327_vm14 = vmor %vm285_vm3, %vm309_vm15  ;;  %2044 = vmatprep.subr.bf16.mxu1 %v2281_v59  ;;  %2029 = vmatpush3.bf16.msra.mxu0 %v2294_v62  ;;  %vm477_vm15 = vcmp.eq.s32.totalorder %v2924_v8, %v3058_v32 }
 0x160   :  { %vm336_vm9 = vmor %vm294_vm2, %vm318_vm8  ;;  %2030 = vmatprep.subr.bf16.mxu0 %v2296_v63  ;;  %vm486_vm8 = vcmp.eq.s32.totalorder %v3017_v22, %v3058_v32 }
 0x161   :  { %vm369_vm4 = vmor %vm327_vm14, %vm351_vm6  ;;  %vm161_vm6 = vcmp.eq.s32.totalorder %v2766_v48, %v3127_v9  ;;  %vm185_vm14 = vcmp.eq.s32.totalorder %v2764_v47, %v3127_v9 }
 0x162   :  { %vm378_vm13 = vmor %vm336_vm9, %vm360_vm0  ;;  %2045 = vmatpush3.bf16.msra.mxu1 %v2283_v0  ;;  %vm170_vm9 = vcmp.eq.s32.totalorder %v2773_v51, %v3127_v9 }
 0x163   :  { %vm411_vm12 = vmor %vm369_vm4, %vm393_vm11  ;;  %2046 = vmatprep.subr.bf16.mxu1 %v2285_v2  ;;  %2031 = vmatpush3.bf16.msra.mxu0 %v2298_v3  ;;  %vm194_vm11 = vcmp.eq.s32.totalorder %v2771_v50, %v3127_v9 }
 0x164   :  { %vm420_vm5 = vmor %vm378_vm13, %vm402_vm10  ;;  %2032 = vmatprep.subr.bf16.mxu0 %v2300_v6  ;;  %vm227_vm10 = vcmp.eq.s32.totalorder %v2788_v54, %v3127_v9 }
 0x165   :  { %vm453_vm3 = vmor %vm411_vm12, %vm435_vm1  ;;  %vm236_vm1 = vcmp.eq.s32.totalorder %v2786_v53, %v3127_v9 }
 0x166   :  { %vm462_vm2 = vmor %vm420_vm5, %vm444_vm7  ;;  %2047 = vmatpush3.bf16.msra.mxu1 %v2287_v10  ;;  %vm269_vm7 = vcmp.eq.s32.totalorder %v2818_v57, %v3127_v9 }
 0x167   :  { %vm495_vm0 = vmor %vm453_vm3, %vm477_vm15  ;;  %2048 = vmatprep.subr.bf16.mxu1 %v2289_v11  ;;  %2033 = vmatpush3.bf16.msra.mxu0 %v2302_v12  ;;  %vm278_vm15 = vcmp.eq.s32.totalorder %v2820_v58, %v3127_v9 }
 0x168   :  { %vm504_vm4 = vmor %vm462_vm2, %vm486_vm8  ;;  %v1858_v19 = vsel %vm495_vm0, 1.0, %v2576_v25  ;;  %2034 = vmatprep.subr.bf16.mxu0 %v2304_v14  ;;  %vm311_vm8 = vcmp.eq.s32.totalorder %v2840_v60, %v3127_v9  ;;  %vm353_vm0 = vcmp.eq.s32.totalorder %v2844_v61, %v3127_v9 }
 0x169   :  { %v1867_v20 = vsel %vm504_vm4, 1.0, %v2576_v25  ;;  %vm203_vm13 = vmor %vm161_vm6, %vm185_vm14  ;;  %vm320_vm6 = vcmp.eq.s32.totalorder %v2866_v1, %v3127_v9 }
 0x16a   :  { %v549_v21 = vpack.c.bf16 %v1867_v20, %v1858_v19  ;;  %vm212_vm12 = vmor %vm170_vm9, %vm194_vm11  ;;  %2049 = vmatpush3.bf16.msra.mxu1 %v2291_v15  ;;  %vm362_vm11 = vcmp.eq.s32.totalorder %v2892_v4, %v3127_v9 }
 0x16b   :  { %vm245_vm5 = vmor %vm203_vm13, %vm227_vm10  ;;  %2050 = vmatprep.subr.bf16.mxu1 %v2293_v16  ;;  %2035 = vmatpush3.bf16.msra.mxu0 %v2306_v18  ;;  %vm395_vm10 = vcmp.eq.s32.totalorder %v2914_v7, %v3127_v9 }
 0x16c   :  { %1243 = vmatprep.mubr.bf16.mxu0 %v549_v21  ;;  %vm254_vm3 = vmor %vm212_vm12, %vm236_vm1  ;;  %2106 = vmatprep.subr.bf16.mxu0 %v2576_v25  ;;  %vm404_vm1 = vcmp.eq.s32.totalorder %v2898_v5, %v3127_v9 }
 0x16d   :  { %vm287_vm2 = vmor %vm245_vm5, %vm269_vm7  ;;  %vm437_vm7 = vcmp.eq.s32.totalorder %v2951_v13, %v3127_v9 }
 0x16e   :  { %vm296_vm14 = vmor %vm254_vm3, %vm278_vm15  ;;  %2051 = vmatpush3.bf16.msra.mxu1 %v2295_v23  ;;  %vm446_vm15 = vcmp.eq.s32.totalorder %v2977_v17, %v3127_v9 }
 0x16f   :  { %vm329_vm9 = vmor %vm287_vm2, %vm311_vm8  ;;  %2052 = vmatprep.subr.bf16.mxu1 %v2297_v24  ;;  %vm479_vm8 = vcmp.eq.s32.totalorder %v2924_v8, %v3127_v9 }
 0x170   :  { %vm338_vm4 = vmor %vm296_vm14, %vm320_vm6  ;;  %vm488_vm6 = vcmp.eq.s32.totalorder %v3017_v22, %v3127_v9 }
 0x171   :  { %vm371_vm13 = vmor %vm329_vm9, %vm353_vm0  ;;  %vm158_vm0 = vcmp.eq.s32.totalorder %v2766_v48, %v141_v29  ;;  %vm182_vm9 = vcmp.eq.s32.totalorder %v2764_v47, %v141_v29 }
 0x172   :  { %vm380_vm12 = vmor %vm338_vm4, %vm362_vm11  ;;  %2053 = vmatpush3.bf16.msra.mxu1 %v2299_v26  ;;  %vm167_vm4 = vcmp.eq.s32.totalorder %v2773_v51, %v141_v29 }
 0x173   :  { %vm413_vm5 = vmor %vm371_vm13, %vm395_vm10  ;;  %2054 = vmatprep.subr.bf16.mxu1 %v2301_v27  ;;  %vm191_vm10 = vcmp.eq.s32.totalorder %v2771_v50, %v141_v29 }
 0x174   :  { %vm422_vm3 = vmor %vm380_vm12, %vm404_vm1  ;;  %vm224_vm1 = vcmp.eq.s32.totalorder %v2788_v54, %v141_v29 }
 0x175   :  { %vm455_vm2 = vmor %vm413_vm5, %vm437_vm7  ;;  %vm233_vm7 = vcmp.eq.s32.totalorder %v2786_v53, %v141_v29 }
 0x176   :  { %vm464_vm14 = vmor %vm422_vm3, %vm446_vm15  ;;  %2055 = vmatpush3.bf16.msra.mxu1 %v2303_v28  ;;  %vm266_vm15 = vcmp.eq.s32.totalorder %v2818_v57, %v141_v29 }
 0x177   :  { %vm497_vm11 = vmor %vm455_vm2, %vm479_vm8  ;;  %2056 = vmatprep.subr.bf16.mxu1 %v2305_v30  ;;  %vm275_vm8 = vcmp.eq.s32.totalorder %v2820_v58, %v141_v29 }
 0x178   :  { %vm506_vm13 = vmor %vm464_vm14, %vm488_vm6  ;;  %v1860_v32 = vsel %vm497_vm11, 1.0, %v2576_v25  ;;  %vm308_vm6 = vcmp.eq.s32.totalorder %v2840_v60, %v141_v29  ;;  %vm317_vm11 = vcmp.eq.s32.totalorder %v2866_v1, %v141_v29 }
 0x179   :  { %v1869_v33 = vsel %vm506_vm13, 1.0, %v2576_v25  ;;  %vm200_vm12 = vmor %vm158_vm0, %vm182_vm9  ;;  %vm350_vm9 = vcmp.eq.s32.totalorder %v2844_v61, %v141_v29 }
 0x17a   :  { %v551_v34 = vpack.c.bf16 %v1869_v33, %v1860_v32  ;;  %2057 = vmatpush3.bf16.msra.mxu1 %v2307_v31  ;;  %vm209_vm5 = vmor %vm167_vm4, %vm191_vm10  ;;  %vm359_vm4 = vcmp.eq.s32.totalorder %v2892_v4, %v141_v29 }
 0x17b   :  { %vm242_vm3 = vmor %vm200_vm12, %vm224_vm1  ;;  %2126 = vmatprep.subr.bf16.mxu1 %v2576_v25  ;;  %vm392_vm1 = vcmp.eq.s32.totalorder %v2914_v7, %v141_v29 }
 0x17c   :  { %1284 = vmatprep.mubr.bf16.mxu1 %v551_v34  ;;  %vm251_vm2 = vmor %vm209_vm5, %vm233_vm7  ;;  %vm401_vm5 = vcmp.eq.s32.totalorder %v2898_v5, %v141_v29 }
 0x17d   :  { %vm284_vm14 = vmor %vm242_vm3, %vm266_vm15  ;;  %vm434_vm3 = vcmp.eq.s32.totalorder %v2951_v13, %v141_v29 }
 0x17e   :  { %vm293_vm0 = vmor %vm251_vm2, %vm275_vm8  ;;  %vm443_vm8 = vcmp.eq.s32.totalorder %v2977_v17, %v141_v29 }
 0x17f   :  { %vm326_vm13 = vmor %vm284_vm14, %vm308_vm6  ;;  %vm476_vm6 = vcmp.eq.s32.totalorder %v2924_v8, %v141_v29 }
 0x180   :  { %vm335_vm10 = vmor %vm293_vm0, %vm317_vm11  ;;  %vm485_vm11 = vcmp.eq.s32.totalorder %v3017_v22, %v141_v29 }
 0x181   :  { %vm368_vm12 = vmor %vm326_vm13, %vm350_vm9  ;;  %vm160_vm9 = vcmp.eq.s32.totalorder %v2766_v48, %v3197_v35  ;;  %vm184_vm13 = vcmp.eq.s32.totalorder %v2764_v47, %v3197_v35 }
 0x182   :  { %vm377_vm7 = vmor %vm335_vm10, %vm359_vm4  ;;  %vm169_vm10 = vcmp.eq.s32.totalorder %v2773_v51, %v3197_v35 }
 0x183   :  { %vm410_vm15 = vmor %vm368_vm12, %vm392_vm1  ;;  %vm193_vm1 = vcmp.eq.s32.totalorder %v2771_v50, %v3197_v35 }
 0x184   :  { %vm419_vm2 = vmor %vm377_vm7, %vm401_vm5  ;;  %vm226_vm5 = vcmp.eq.s32.totalorder %v2788_v54, %v3197_v35 }
 0x185   :  { %vm452_vm14 = vmor %vm410_vm15, %vm434_vm3  ;;  %vm235_vm3 = vcmp.eq.s32.totalorder %v2786_v53, %v3197_v35 }
 0x186   :  { %vm461_vm0 = vmor %vm419_vm2, %vm443_vm8  ;;  %vm268_vm8 = vcmp.eq.s32.totalorder %v2818_v57, %v3197_v35 }
 0x187   :  { %vm494_vm4 = vmor %vm452_vm14, %vm476_vm6  ;;  %vm277_vm6 = vcmp.eq.s32.totalorder %v2820_v58, %v3197_v35 }
 0x188   :  { %vm503_vm12 = vmor %vm461_vm0, %vm485_vm11  ;;  %v1857_v36 = vsel %vm494_vm4, 1.0, %v2576_v25  ;;  %vm310_vm11 = vcmp.eq.s32.totalorder %v2840_v60, %v3197_v35 }
 0x189   :  { %v1866_v37 = vsel %vm503_vm12, 1.0, %v2576_v25  ;;  %vm202_vm7 = vmor %vm160_vm9, %vm184_vm13  ;;  %vm319_vm9 = vcmp.eq.s32.totalorder %v2866_v1, %v3197_v35  ;;  %vm2577_vm13 = vmmov 0   ;;  %vm361_vm12 = vcmp.eq.s32.totalorder %v2892_v4, %v3197_v35 }
 0x18a   :  { %v548_v39 = vpack.c.bf16 %v1866_v37, %v1857_v36  ;;  %vm211_vm15 = vmor %vm169_vm10, %vm193_vm1  ;;  %vm352_vm10 = vcmp.eq.s32.totalorder %v2844_v61, %v3197_v35 }
 0x18b   :  { %vm244_vm2 = vmor %vm202_vm7, %vm226_vm5  ;;  %vm394_vm7 = vcmp.eq.s32.totalorder %v2914_v7, %v3197_v35 }
 0x18c   :  { %1244 = vmatmul.mubr.bf16.vlgmr.msra.gmra.mrb[4].mxu0 %v548_v39  ;;  %vm253_vm14 = vmor %vm211_vm15, %vm235_vm3  ;;  %vm403_vm15 = vcmp.eq.s32.totalorder %v2898_v5, %v3197_v35 }
 0x18d   :  { %vm286_vm0 = vmor %vm244_vm2, %vm268_vm8  ;;  %2107 = vmatpush3.bf16.msra.mxu0 %v2308_v38  ;;  %2122 = vmatprep.mubr.msk.bf16.mxu0 %vm2577_vm13, %v2576_v25  ;;  %vm436_vm2 = vcmp.eq.s32.totalorder %v2951_v13, %v3197_v35 }
 0x18e   :  { %vm295_vm4 = vmor %vm253_vm14, %vm277_vm6  ;;  %2108 = vmatprep.subr.bf16.mxu0 %v2576_v25  ;;  %vm445_vm14 = vcmp.eq.s32.totalorder %v2977_v17, %v3197_v35 }
 0x18f   :  { %vm328_vm1 = vmor %vm286_vm0, %vm310_vm11  ;;  %vm478_vm0 = vcmp.eq.s32.totalorder %v2924_v8, %v3197_v35 }
 0x190   :  { %vm337_vm5 = vmor %vm295_vm4, %vm319_vm9  ;;  %vm487_vm4 = vcmp.eq.s32.totalorder %v3017_v22, %v3197_v35 }
 0x191   :  { %vm370_vm3 = vmor %vm328_vm1, %vm352_vm10  ;;  %2109 = vmatpush3.bf16.msra.mxu0 %v2309_v40  ;;  %vm162_vm1 = vcmp.eq.s32.totalorder %v2766_v48, %v3239_v42  ;;  %v2312_v48 = vld [vmem:[#allocation5 + $0x220] sm:$0xff]  }
 0x192   :  { %vm379_vm8 = vmor %vm337_vm5, %vm361_vm12  ;;  %2110 = vmatprep.subr.bf16.mxu0 %v2576_v25  ;;  %vm186_vm12 = vcmp.eq.s32.totalorder %v2764_v47, %v3239_v42 }
 0x193   :  { %vm412_vm6 = vmor %vm370_vm3, %vm394_vm7  ;;  %vm171_vm7 = vcmp.eq.s32.totalorder %v2773_v51, %v3239_v42  ;;  %vm195_vm3 = vcmp.eq.s32.totalorder %v2771_v50, %v3239_v42  ;;  %v2313_v50 = vld [vmem:[#allocation5 + $0x228] sm:$0xff]   ;;  %v2314_v51 = vld [vmem:[#allocation5 + $0x230] sm:$0xff]  }
 0x194   :  { %vm421_vm11 = vmor %vm379_vm8, %vm403_vm15  ;;  %vm228_vm8 = vcmp.eq.s32.totalorder %v2788_v54, %v3239_v42 }
 0x195   :  { %vm454_vm9 = vmor %vm412_vm6, %vm436_vm2  ;;  %2111 = vmatpush3.bf16.msra.mxu0 %v2310_v41  ;;  %vm237_vm6 = vcmp.eq.s32.totalorder %v2786_v53, %v3239_v42  ;;  %v2315_v53 = vld [vmem:[#allocation5 + $0x238] sm:$0xff]  }
 0x196   :  { %vm463_vm10 = vmor %vm421_vm11, %vm445_vm14  ;;  %2112 = vmatprep.subr.bf16.mxu0 %v2576_v25  ;;  %vm270_vm11 = vcmp.eq.s32.totalorder %v2818_v57, %v3239_v42 }
 0x197   :  { %vm496_vm5 = vmor %vm454_vm9, %vm478_vm0  ;;  %vm279_vm9 = vcmp.eq.s32.totalorder %v2820_v58, %v3239_v42 }
 0x198   :  { %vm505_vm15 = vmor %vm463_vm10, %vm487_vm4  ;;  %v1859_v46 = vsel %vm496_vm5, 1.0, %v2576_v25  ;;  %vm312_vm10 = vcmp.eq.s32.totalorder %v2840_v60, %v3239_v42  ;;  %v2316_v60 = vld [vmem:[#allocation8] sm:$0xff]  }
 0x199   :  { %v1868_v44 = vsel %vm505_vm15, 1.0, %v2576_v25  ;;  %2113 = vmatpush3.bf16.msra.mxu0 %v2311_v43  ;;  %vm204_vm2 = vmor %vm162_vm1, %vm186_vm12  ;;  %vm321_vm12 = vcmp.eq.s32.totalorder %v2866_v1, %v3239_v42  ;;  %vm363_vm15 = vcmp.eq.s32.totalorder %v2892_v4, %v3239_v42  ;;  %v2318_v1 = vld [vmem:[#allocation8 + $0x10] sm:$0xff]   ;;  %v2319_v4 = vld [vmem:[#allocation8 + $0x18] sm:$0xff]  }
 0x19a   :  { %v550_v47 = vpack.c.bf16 %v1868_v44, %v1859_v46  ;;  %2114 = vmatprep.subr.bf16.mxu0 %v2576_v25  ;;  %vm213_vm14 = vmor %vm171_vm7, %vm195_vm3  ;;  %vm354_vm7 = vcmp.eq.s32.totalorder %v2844_v61, %v3239_v42  ;;  %v2317_v61 = vld [vmem:[#allocation8 + $0x8] sm:$0xff]   ;;  %v2325_v43 = vld [vmem:[#allocation8 + $0x40] sm:$0xff]  }
 0x19b   :  { %vm246_vm0 = vmor %vm204_vm2, %vm228_vm8  ;;  %vm396_vm2 = vcmp.eq.s32.totalorder %v2914_v7, %v3239_v42  ;;  %v2321_v7 = vld [vmem:[#allocation8 + $0x28] sm:$0xff]   ;;  %v2327_v44 = vld [vmem:[#allocation8 + $0x50] sm:$0xff]  }
 0x19c   :  { %1285 = vmatmul.mubr.bf16.vlgmr.msra.gmra.mrb[4].mxu1 %v550_v47  ;;  %vm255_vm4 = vmor %vm213_vm14, %vm237_vm6  ;;  %vm405_vm14 = vcmp.eq.s32.totalorder %v2898_v5, %v3239_v42  ;;  %v2320_v5 = vld [vmem:[#allocation8 + $0x20] sm:$0xff]   ;;  %v2326_v46 = vld [vmem:[#allocation8 + $0x48] sm:$0xff]  }
 0x19d   :  { %2115 = vmatpush3.bf16.msra.mxu0 %v2312_v48  ;;  %vm288_vm1 = vmor %vm246_vm0, %vm270_vm11  ;;  %2142 = vmatprep.mubr.msk.bf16.mxu1 %vm2577_vm13, %v2576_v25  ;;  %vm438_vm0 = vcmp.eq.s32.totalorder %v2951_v13, %v3239_v42  ;;  %v2323_v13 = vld [vmem:[#allocation8 + $0x38] sm:$0xff]   ;;  %v2329_v47 = vld [vmem:[#allocation8 + $0x60] sm:$0xff]  }
 0x19e   :  { %2116 = vmatprep.subr.bf16.mxu0 %v2576_v25  ;;  %vm297_vm5 = vmor %vm255_vm4, %vm279_vm9  ;;  %vm447_vm4 = vcmp.eq.s32.totalorder %v2977_v17, %v3239_v42  ;;  %2127 = vmatpush3.bf16.msra.mxu1 %v2316_v60  ;;  %v2328_v48 = vld [vmem:[#allocation8 + $0x58] sm:$0xff]  }
 0x19f   :  { %vm330_vm3 = vmor %vm288_vm1, %vm312_vm10  ;;  %vm480_vm1 = vcmp.eq.s32.totalorder %v2924_v8, %v3239_v42  ;;  %2128 = vmatprep.subr.bf16.mxu1 %v2576_v25  ;;  %v2322_v8 = vld [vmem:[#allocation8 + $0x30] sm:$0xff]  }
 0x1a0   :  { %vm339_vm8 = vmor %vm297_vm5, %vm321_vm12  ;;  %vm489_vm5 = vcmp.eq.s32.totalorder %v3017_v22, %v3239_v42  ;;  %v2324_v42 = vld [vmem:[#allocation7] sm:$0xff]  }
 0x1a1   :  { %2117 = vmatpush3.bf16.msra.mxu0 %v2313_v50  ;;  %vm372_vm6 = vmor %vm330_vm3, %vm354_vm7  ;;  %v2330_v50 = vld [vmem:[#allocation8 + $0x68] sm:$0xff]  }
 0x1a2   :  { %2118 = vmatprep.subr.bf16.mxu0 %v2576_v25  ;;  %vm381_vm11 = vmor %vm339_vm8, %vm363_vm15  ;;  %2129 = vmatpush3.bf16.msra.mxu1 %v2317_v61  ;;  %vm1455_vm8 = vcmask 130048  }
 0x1a3   :  { %vm414_vm9 = vmor %vm372_vm6, %vm396_vm2  ;;  %2130 = vmatprep.subr.bf16.mxu1 %v2576_v25  ;;  %vm1669_vm6 = vcmask 123904  }
 0x1a4   :  { %vm423_vm10 = vmor %vm381_vm11, %vm405_vm14 }
 0x1a5   :  { %2119 = vmatpush3.bf16.msra.mxu0 %v2314_v51  ;;  %vm456_vm12 = vmor %vm414_vm9, %vm438_vm0  ;;  %v2331_v51 = vld [vmem:[#allocation8 + $0x70] sm:$0xff]  }
 0x1a6   :  { %2120 = vmatprep.subr.bf16.mxu0 %v2576_v25  ;;  %vm465_vm7 = vmor %vm423_vm10, %vm447_vm4  ;;  %2131 = vmatpush3.bf16.msra.mxu1 %v2318_v1 }
 0x1a7   :  { %vm498_vm3 = vmor %vm456_vm12, %vm480_vm1  ;;  %2132 = vmatprep.subr.bf16.mxu1 %v2576_v25 }
 0x1a8   :  { %vm507_vm15 = vmor %vm465_vm7, %vm489_vm5  ;;  %v1861_v54 = vsel %vm498_vm3, 1.0, %v2576_v25 }
 0x1a9   :  { %2121 = vmatpush3.bf16.msra.mxu0 %v2315_v53  ;;  %v1870_v57 = vsel %vm507_vm15, 1.0, %v2576_v25  ;;  %v2332_v53 = vld [vmem:[#allocation8 + $0x78] sm:$0xff]  }
 0x1aa   :  { %v552_v58 = vpack.c.bf16 %v1870_v57, %v1861_v54  ;;  %2172 = vmatprep.subr.bf16.mxu0 %v2576_v25  ;;  %2133 = vmatpush3.bf16.msra.mxu1 %v2319_v4  ;;  %v1951_v54 = vld [vmem:[#allocation10] ss:$0 sm:$0xff] }
 0x1ab   :  { %2134 = vmatprep.subr.bf16.mxu1 %v2576_v25 }
 0x1ac   :  { %2123 = vmatmul.mubr.bf16.vlgmr.msra.gmra.mrb[8].mxu0 %v552_v58 }
 0x1ad   :  { %2174 = vmatprep.mubr.msk.bf16.mxu0 %vm2577_vm13, %v2576_v25 }
 0x1ae   :  { %2135 = vmatpush3.bf16.msra.mxu1 %v2320_v5 }
 0x1af   :  { %2136 = vmatprep.subr.bf16.mxu1 %v2576_v25 }
 0x1b2   :  { %2137 = vmatpush3.bf16.msra.mxu1 %v2321_v7 }
 0x1b3   :  { %2138 = vmatprep.subr.bf16.mxu1 %v2576_v25 }
 0x1b6   :  { %2139 = vmatpush3.bf16.msra.mxu1 %v2322_v8 }
 0x1b7   :  { %2140 = vmatprep.subr.bf16.mxu1 %v2576_v25 }
 0x1ba   :  { %2141 = vmatpush3.bf16.msra.mxu1 %v2323_v13 }
 0x1bb   :  { %2146 = vmatprep.subr.bf16.mxu1 %v2576_v25 }
 0x221   :  { %v1992_v17 = vpop.f32.mrb[0].mxu0 }
 0x222   :  { %v1993_v22 = vpop.f32.mrb[1].mxu0 }
 0x223   :  { %v1994_v49 = vadd.f32 %v1993_v22, %v1992_v17  ;;  %v1995_v52 = vpop.f32.mrb[2].mxu0 }
 0x224   :  { %v1996_v55 = vpop.f32.mrb[3].mxu0 }
 0x225   :  { %v1997_v56 = vadd.f32 %v1996_v55, %v1995_v52  ;;  %v1660_v55 = vshrl.u32 %v136_v45, 7  ;;  %v2334_v45 = vld [vmem:[#allocation13 + $0x8] sm:$0xff]  }
 0x230   :  { %v2014_v59 = vpop.f32.mrb[0].mxu1 }
 0x231   :  { %v2015_v62 = vpop.f32.mrb[1].mxu1 }
 0x232   :  { %v2016_v63 = vadd.f32 %v2015_v62, %v2014_v59  ;;  %v2017_v0 = vpop.f32.mrb[2].mxu1 }
 0x233   :  { %v2018_v2 = vpop.f32.mrb[3].mxu1 }
 0x234   :  { %v1205_v3 = vadd.f32 %v2016_v63, %v1994_v49  ;;  %v2019_v6 = vadd.f32 %v2018_v2, %v2017_v0  ;;  %v1962_v63 = vld [vmem:[#allocation10 + $0x1] ss:$0 sm:$0xff] }
 0x236   :  { %v1208_v9 = vadd.f32 %v2019_v6, %v1997_v56  ;;  %v1964_v56 = vld [vmem:[#allocation11] ss:$0 sm:$0xff] }
 0x237   :  { %vm1666_vm2 = vcmp.eq.s32.totalorder %v1964_v56, %v1660_v55 }
 0x238   :  { %v1965_v59 = vsel %vm1666_vm2, 1.0, %v2576_v25 }
 0x239   :  { %v1670_v62 = vsel %vm1669_vm6, %v1965_v59, 0.0 }
 0x23a   :  { %1671 = vadd.xlane.f32.xlu1 %v1670_v62 }
 0x25f   :  { %v2036_v10 = vpop.f32.mrb[4].mxu0 }
 0x260   :  { %v2037_v11 = vpop.f32.mrb[5].mxu0 }
 0x261   :  { %v2038_v12 = vadd.f32 %v2037_v11, %v2036_v10  ;;  %v2039_v14 = vpop.f32.mrb[6].mxu0 }
 0x262   :  { %v2040_v15 = vpop.f32.mrb[7].mxu0 }
 0x263   :  { %v1246_v16 = vadd.f32 %v2038_v12, %v1205_v3  ;;  %v2041_v18 = vadd.f32 %v2040_v15, %v2039_v14  ;;  %v1675_v12 = vpack.c.bf16 %v1965_v59, %v1965_v59  ;;  %v2333_v14 = vld [vmem:[#allocation13] sm:$0xff]   ;;  %v2335_v15 = vld [vmem:[#allocation13 + $0x10] sm:$0xff]  }
 0x265   :  { %v1249_v19 = vadd.f32 %v2041_v18, %v1208_v9  ;;  %v2337_v18 = vld [vmem:[#allocation13 + $0x20] sm:$0xff]  }
 0x26f   :  { %v2058_v20 = vpop.f32.mrb[4].mxu1 }
 0x270   :  { %v2059_v21 = vpop.f32.mrb[5].mxu1 }
 0x271   :  { %v2060_v23 = vadd.f32 %v2059_v21, %v2058_v20  ;;  %v2061_v24 = vpop.f32.mrb[6].mxu1  ;;  %v2339_v20 = vld [vmem:[#allocation13 + $0x30] sm:$0xff]   ;;  %v2340_v21 = vld [vmem:[#allocation13 + $0x38] sm:$0xff]  }
 0x272   :  { %v2062_v26 = vpop.f32.mrb[7].mxu1 }
 0x273   :  { %v2063_v27 = vadd.f32 %v2062_v26, %v2061_v24  ;;  %v1287_v28 = vadd.f32 %v2060_v23, %v1246_v16  ;;  %v2336_v16 = vld [vmem:[#allocation13 + $0x18] sm:$0xff]  }
 0x275   :  { %v1290_v29 = vadd.f32 %v2063_v27, %v1249_v19  ;;  %v2338_v19 = vld [vmem:[#allocation13 + $0x28] sm:$0xff]  }
 0x27f   :  { %v1327_v30 = vpop.f32.mrb[8].mxu0 }
 0x280   :  { %v1328_v31 = vadd.f32 %v1327_v30, %v1287_v28  ;;  %v2124_v32 = vpop.f32.mrb[9].mxu0 }
 0x281   :  { %v1330_v33 = vpop.f32.mrb[10].mxu0 }
 0x282   :  { %v1331_v34 = vadd.f32 %v1330_v33, %v1290_v29  ;;  %v2125_v35 = vpop.f32.mrb[11].mxu0  ;;  %v1967_v33 = vld [vmem:[#allocation14] ss:$0 sm:$0xff] }
 0x284   :  { %v1336_v36 = vpack.c.bf16 %v1331_v34, %v1328_v31 }
 0x286   :  { %2143 = vmatmul.mubr.bf16.vlgmr.msra.gmra.mrb[8].mxu1 %v1336_v36 }
 0x287   :  { %2148 = vmatprep.mubr.msk.bf16.mxu1 %vm2577_vm13, %v2576_v25 }
 0x2c7   :  { %v1672_v23 = vpop.xlane.xlu1 %1671 }
 0x2c8   :  { %v1673_v24 = vmax.f32 %v1672_v23, 1.0 }
 0x2ca   :  { %2341 = vrcp.f32 %v1673_v24 }
 0x2d4   :  { %v2342_v26 = vpop.eup %2341 }
 0x359   :  { %v1435_v37 = vpop.f32.mrb[8].mxu1 }
 0x35a   :  { %v2144_v38 = vpop.f32.mrb[9].mxu1 }
 0x35b   :  { %v1438_v39 = vpop.f32.mrb[10].mxu1 }
 0x35c   :  { %v1442_v40 = vpack.c.bf16 %v1438_v39, %v1435_v37  ;;  %v2145_v41 = vpop.f32.mrb[11].mxu1 }
 0x35e   :  { %2147 = vmatpush3.bf16.msra.mxu1 %v1442_v40 }
 0x35f   :  { %2152 = vmatprep.subr.bf16.mxu1 %v2576_v25 }
 0x361   :  { %2149 = vmatmul.mubr.msk.bf16.vlgmr.msra.gmra.mrb[12].mxu1 %vm1455_vm8, %v2324_v42 }
 0x362   :  { %2153 = vmatpush3.bf16.msra.mxu1 %v2325_v43  ;;  %2168 = vmatprep.mubr.msk.bf16.mxu1 %vm2577_vm13, %v2576_v25 }
 0x363   :  { %2154 = vmatprep.subr.bf16.mxu1 %v2576_v25 }
 0x366   :  { %2155 = vmatpush3.bf16.msra.mxu1 %v2326_v46 }
 0x367   :  { %2156 = vmatprep.subr.bf16.mxu1 %v2576_v25 }
 0x36a   :  { %2157 = vmatpush3.bf16.msra.mxu1 %v2327_v44 }
 0x36b   :  { %2158 = vmatprep.subr.bf16.mxu1 %v2576_v25 }
 0x36e   :  { %2159 = vmatpush3.bf16.msra.mxu1 %v2328_v48 }
 0x36f   :  { %2160 = vmatprep.subr.bf16.mxu1 %v2576_v25 }
 0x372   :  { %2161 = vmatpush3.bf16.msra.mxu1 %v2329_v47 }
 0x373   :  { %2162 = vmatprep.subr.bf16.mxu1 %v2576_v25 }
 0x376   :  { %2163 = vmatpush3.bf16.msra.mxu1 %v2330_v50 }
 0x377   :  { %2164 = vmatprep.subr.bf16.mxu1 %v2576_v25 }
 0x37a   :  { %2165 = vmatpush3.bf16.msra.mxu1 %v2331_v51 }
 0x37b   :  { %2166 = vmatprep.subr.bf16.mxu1 %v2576_v25 }
 0x37e   :  { %2167 = vmatpush3.bf16.msra.mxu1 %v2332_v53 }
 0x434   :  { %v1493_v57 = vpop.f32.mrb[12].mxu1 }
 0x435   :  { %v1494_v58 = vadd.f32 %v1951_v54, %v1493_v57  ;;  %v2150_v60 = vpop.f32.mrb[13].mxu1 }
 0x436   :  { %v1496_v61 = vpop.f32.mrb[14].mxu1 }
 0x437   :  { %v1497_v1 = vadd.f32 %v1951_v54, %v1496_v61  ;;  %v2151_v4 = vpop.f32.mrb[15].mxu1  ;;  %v1500_v5 = vmax.f32 %v1494_v58, 0.0 }
 0x439   :  { %v1501_v7 = vmax.f32 %v1497_v1, 0.0 }
 0x43b   :  { %v1502_v8 = vpack.c.bf16 %v1501_v7, %v1500_v5 }
 0x43d   :  { %2169 = vmatmul.mubr.bf16.vlgmr.msra.gmra.mrb[16].mxu1 %v1502_v8 }
 0x510   :  { %v1602_v13 = vpop.f32.mrb[16].mxu1 }
 0x511   :  { %v2170_v17 = vpop.f32.mrb[17].mxu1 }
 0x512   :  { %v1605_v22 = vpop.f32.mrb[18].mxu1 }
 0x513   :  { %v1609_v49 = vpack.c.bf16 %v1605_v22, %v1602_v13  ;;  %v2171_v52 = vpop.f32.mrb[19].mxu1 }
 0x515   :  { %2173 = vmatpush3.bf16.msra.mxu0 %v1609_v49 }
 0x516   :  { %2178 = vmatprep.subr.bf16.mxu0 %v2576_v25 }
 0x518   :  { %2175 = vmatmul.mubr.msk.bf16.vlgmr.msra.gmra.mrb[12].mxu0 %vm1455_vm8, %v2324_v42 }
 0x519   :  { %2180 = vmatprep.mubr.msk.bf16.mxu0 %vm2577_vm13, %v2576_v25 }
 0x5eb   :  { %v1652_v0 = vpop.f32.mrb[12].mxu0 }
 0x5ec   :  { %v2176_v2 = vpop.f32.mrb[13].mxu0  ;;  %v1653_v6 = vadd.f32 %v1962_v63, %v1652_v0 }
 0x5ed   :  { %v1655_v3 = vpop.f32.mrb[14].mxu0 }
 0x5ee   :  { %v1656_v9 = vadd.f32 %v1962_v63, %v1655_v3  ;;  %v2177_v10 = vpop.f32.mrb[15].mxu0 }
 0x5f0   :  { %v1676_v11 = vpack.c.bf16 %v1656_v9, %v1653_v6 }
 0x5f2   :  { %2179 = vmatpush3.bf16.msra.mxu0 %v1676_v11 }
 0x5f3   :  { %2184 = vmatprep.subr.bf16.mxu0 %v2576_v25 }
 0x5f5   :  { %2181 = vmatmul.mubr.msk.bf16.vlgmr.msra.gmra.mrb[16].mxu0 %vm1455_vm8, %v1675_v12 }
 0x5f6   :  { %2185 = vmatpush3.bf16.msra.mxu0 %v2333_v14  ;;  %2200 = vmatprep.mubr.msk.bf16.mxu0 %vm2577_vm13, %v2576_v25 }
 0x5f7   :  { %2186 = vmatprep.subr.bf16.mxu0 %v2576_v25 }
 0x5fa   :  { %2187 = vmatpush3.bf16.msra.mxu0 %v2334_v45 }
 0x5fb   :  { %2188 = vmatprep.subr.bf16.mxu0 %v2576_v25 }
 0x5fe   :  { %2189 = vmatpush3.bf16.msra.mxu0 %v2335_v15 }
 0x5ff   :  { %2190 = vmatprep.subr.bf16.mxu0 %v2576_v25 }
 0x602   :  { %2191 = vmatpush3.bf16.msra.mxu0 %v2336_v16 }
 0x603   :  { %2192 = vmatprep.subr.bf16.mxu0 %v2576_v25 }
 0x606   :  { %2193 = vmatpush3.bf16.msra.mxu0 %v2337_v18 }
 0x607   :  { %2194 = vmatprep.subr.bf16.mxu0 %v2576_v25 }
 0x60a   :  { %2195 = vmatpush3.bf16.msra.mxu0 %v2338_v19 }
 0x60b   :  { %2196 = vmatprep.subr.bf16.mxu0 %v2576_v25 }
 0x60e   :  { %2197 = vmatpush3.bf16.msra.mxu0 %v2339_v20 }
 0x60f   :  { %2198 = vmatprep.subr.bf16.mxu0 %v2576_v25 }
 0x612   :  { %2199 = vmatpush3.bf16.msra.mxu0 %v2340_v21 }
 0x6c8   :  { %v1714_v27 = vpop.f32.mrb[16].mxu0 }
 0x6c9   :  { %v1720_v28 = vmul.f32 %v2342_v26, %v1714_v27  ;;  %v2182_v29 = vpop.f32.mrb[17].mxu0 }
 0x6ca   :  { %v1717_v30 = vpop.f32.mrb[18].mxu0 }
 0x6cb   :  { %v1721_v31 = vpack.c.bf16 %v1720_v28, %v1720_v28  ;;  %v2183_v32 = vpop.f32.mrb[19].mxu0 }
 0x6cd   :  { %2201 = vmatmul.mubr.bf16.vlgmr.msra.gmra.mrb[20].mxu0 %v1721_v31 }
 0x7a0   :  { %v1827_v34 = vpop.f32.mrb[20].mxu0 }
 0x7a1   :  { %v1828_v35 = vadd.f32 %v1967_v33, %v1827_v34  ;;  %v2202_v36 = vpop.f32.mrb[21].mxu0 }
 0x7a2   :  { %v1830_v25 = vpop.f32.mrb[22].mxu0 }
 0x7a3   :  { %1833 = vst [vmem:[#allocation16] sm:$0x3] %v1828_v35  ;;  %v2203_v37 = vpop.f32.mrb[23].mxu0 }
 0x7a4   :  { %2530 = shalt.err (!%p2527_p12)
}
 0x7a5   :  { %s2531_s13 = scalar_lea.hbm %s3355_s8, 32 }
 0x7a6   :  { %p2532_p13 = scmp.ne.s32.totalorder %s3355_s8, %s2531_s13  ;;  %p2535_p0 = scmp.lt.u32.totalorder %s2531_s13, %s3355_s8 }
 0x7a8   :  { %p2537_p1 = pnand %p2535_p0, %p2532_p13 }
 0x7aa   :  { %2540 = shalt.err (!%p2537_p1)
}
 0x7ab   :  { %1843 = dma.vmem_to_hbm [thread:$0]  %s1841_s16, 32, %s3355_s8, [#allocation4]  }
 0x7ac   :  { %2551 = dma.done.wait [#allocation4], 32  }
 0x7ad   :  { %2552 = vsyncadd [#allocation4], 4294967264 }
 0x7ae   :  { %1847 = vsyncpa [#allocation3], 1 }
 0x7af   :  { %1848 = vsyncpa [#allocation6], 1 }
 0x7b0   :  { %1849 = vsyncpa [#allocation9], 1 }
 0x7b1   :  { %1850 = vsyncpa [#allocation12], 1 }
 0x7b2   :  { %1851 = vsyncpa [#allocation15], 1 }
 0x7b3   :  { %1852 = vsyncpa [#allocation4], 1 }

</bundles_post_ra>
